<compile_context>
chip_gen: v5e
topology: v5e:2x2
jax: 0.10.0
libtpu: 0.0.40
codegen_flags: <defaults>
</compile_context>

<pallas_src>
import functools

import jax
import jax.numpy as jnp
from jax.experimental import pallas as pl
from jax.experimental.pallas import tpu as pltpu

LEAKY_SLOPE = 0.01   # nn.LeakyReLU default negative_slope
BN_EPS = 1e-5        # nn.BatchNorm2d default eps


def _leaky(x):
    return jnp.where(x >= 0, x, LEAKY_SLOPE * x)


def _round_up(x, m):
    return ((x + m - 1) // m) * m


# --------------------------------------------------------------------------- #
# Pallas kernel: [pre LeakyReLU] -> im2col GEMM (= 3x3 conv) -> folded BN -> LeakyReLU
# --------------------------------------------------------------------------- #
def _gemm_bn_act_kernel(x_ref, w_ref, scale_ref, shift_ref, o_ref, *, pre_act):
    x = x_ref[...]
    if pre_act:                      # post-concat LeakyReLU, fused into conv1
        x = _leaky(x)
    # MXU matmul, f32 accumulation.
    y = jnp.dot(x, w_ref[...], preferred_element_type=jnp.float32)
    # Conv bias + eval-mode BatchNorm pre-folded into one multiply-add.
    y = y * scale_ref[...] + shift_ref[...]
    o_ref[...] = _leaky(y).astype(o_ref.dtype)


def _pick_tile_rows(rows, k, f_pad, *, max_tile=512, budget_bytes=24 * 1024 * 1024):
    """Row tile sized so double-buffered blocks fit scoped VMEM on all gens
    (v7x has 64 MiB VMEM / 32 MiB default scoped limit)."""
    tile = min(max_tile, _round_up(rows, 8))
    per_row = 2 * 4 * (k + f_pad)               # double-buffered x-tile + out-tile (f32)
    fixed = 2 * 4 * (k * f_pad + 2 * f_pad)     # resident weight + scale/shift
    while tile > 8 and fixed + tile * per_row > budget_bytes:
        tile //= 2
    return max(_round_up(tile, 8), 8)


def conv3x3_bn_act(x_nhwc, w_oihw, bias, gamma, beta, mean, var, *, pre_act):
    """Fused Conv2d(3x3, stride 1, pad 1, bias) -> BatchNorm2d(eval) -> LeakyReLU.

    x_nhwc: (N, H, W, C_in);  w_oihw: (C_out, C_in, 3, 3).  Returns (N, H, W, C_out).
    """
    n, h, w, c_in = x_nhwc.shape
    c_out = w_oihw.shape[0]

    # --- im2col (wrapper-side layout plumbing): (N*H*W, 9*C_in), tap order (kh, kw, ci)
    xp = jnp.pad(x_nhwc, ((0, 0), (1, 1), (1, 1), (0, 0)))
    cols = jnp.concatenate(
        [xp[:, kh:kh + h, kw:kw + w, :] for kh in range(3) for kw in range(3)],
        axis=-1,
    ).reshape(n * h * w, 9 * c_in)
    w_mat = jnp.transpose(w_oihw, (2, 3, 1, 0)).reshape(9 * c_in, c_out)

    # --- fold conv bias + eval-mode BN into scale/shift (hoisted out of the kernel)
    scale = gamma * jax.lax.rsqrt(var + BN_EPS)
    shift = beta + (bias - mean) * scale

    # --- lane-dense output: pad feature dim to a multiple of 128 lanes
    f_pad = _round_up(c_out, 128)
    w_mat = jnp.pad(w_mat, ((0, 0), (0, f_pad - c_out)))
    scale = jnp.pad(scale, (0, f_pad - c_out)).reshape(1, f_pad)
    shift = jnp.pad(shift, (0, f_pad - c_out)).reshape(1, f_pad)

    rows = n * h * w
    k = 9 * c_in
    tile = _pick_tile_rows(rows, k, f_pad)
    rows_pad = pl.cdiv(rows, tile) * tile
    cols = jnp.pad(cols, ((0, rows_pad - rows), (0, 0)))

    kernel = functools.partial(_gemm_bn_act_kernel, pre_act=pre_act)

    out = pl.pallas_call(
        kernel,
        out_shape=jax.ShapeDtypeStruct((rows_pad, f_pad), jnp.float32),
        grid_spec=pltpu.PrefetchScalarGridSpec(
            num_scalar_prefetch=0,
            grid=(rows_pad // tile,),
            in_specs=[
                pl.BlockSpec((tile, k), lambda i: (i, 0)),     # row-tiled, pipelined
                pl.BlockSpec((k, f_pad), lambda i: (0, 0)),    # weight stays resident
                pl.BlockSpec((1, f_pad), lambda i: (0, 0)),    # folded BN scale
                pl.BlockSpec((1, f_pad), lambda i: (0, 0)),    # folded BN shift
            ],
            out_specs=pl.BlockSpec((tile, f_pad), lambda i: (i, 0)),
        ),
        compiler_params=pltpu.CompilerParams(
            dimension_semantics=("parallel",),                 # megacore split on v7x
        ),
        cost_estimate=pl.CostEstimate(
            flops=2 * rows_pad * k * f_pad,
            transcendentals=0,
            bytes_accessed=4 * (rows_pad * k + k * f_pad + rows_pad * f_pad),
        ),
    )(cols, w_mat, scale, shift)

    return out[:rows, :c_out].reshape(n, h, w, c_out)


# --------------------------------------------------------------------------- #
# ExpansionBlock forward
# --------------------------------------------------------------------------- #
def _nearest_upsample_nchw(x, h, w):
    """F.interpolate(x, size=(h, w), mode='nearest'): src = floor(dst * in / out)."""
    hx, wx = x.shape[-2], x.shape[-1]
    idx_h = (jnp.arange(h) * hx) // h
    idx_w = (jnp.arange(w) * wx) // w
    return x[:, :, idx_h[:, None], idx_w[None, :]]


def expansion_block_forward(x, bypass, p):
    """ExpansionBlock.forward (eval mode). x: (N, up_in_c, hx, wx) NCHW;
    bypass: hook output (N, bypass_c, H, W). Returns (N, c_out, H, W)."""
    if bypass.ndim == 3:                         # the `bypass.unsqueeze(0)` branch
        bypass = bypass[None]
    _, _, h, w = bypass.shape
    x_up = _nearest_upsample_nchw(x, h, w)
    xc = jnp.concatenate([bypass, x_up], axis=1)            # (N, C_in, H, W)
    xc_nhwc = jnp.transpose(xc, (0, 2, 3, 1))                # channels-last (lane dim)
    # c1: Conv -> BN -> LeakyReLU  (post-concat LeakyReLU fused as pre_act)
    h1 = conv3x3_bn_act(xc_nhwc, p["w1"], p["b1"], p["g1"], p["be1"], p["m1"], p["v1"],
                        pre_act=True)
    # c2: Conv -> BN -> LeakyReLU
    h2 = conv3x3_bn_act(h1, p["w2"], p["b2"], p["g2"], p["be2"], p["m2"], p["v2"],
                        pre_act=False)
    return jnp.transpose(h2, (0, 3, 1, 2))                   # back to NCHW


# --------------------------------------------------------------------------- #
# Pure-JAX reference (same eval-mode semantics) for the correctness check
# --------------------------------------------------------------------------- #
def _reference(x, bypass, p):
    _, _, h, w = bypass.shape
    x_up = _nearest_upsample_nchw(x, h, w)
    xc = jnp.concatenate([bypass, x_up], axis=1)
    a = _leaky(xc)

    def conv_bn_act(inp, wgt, b, gamma, beta, mean, var):
        y = jax.lax.conv_general_dilated(
            inp, wgt, window_strides=(1, 1), padding=((1, 1), (1, 1)),
            dimension_numbers=("NCHW", "OIHW", "NCHW"))
        y = y + b[None, :, None, None]
        inv = jax.lax.rsqrt(var + BN_EPS)
        y = ((y - mean[None, :, None, None]) * (gamma * inv)[None, :, None, None]
             + beta[None, :, None, None])
        return _leaky(y)

    h1 = conv_bn_act(a, p["w1"], p["b1"], p["g1"], p["be1"], p["m1"], p["v1"])
    return conv_bn_act(h1, p["w2"], p["b2"], p["g2"], p["be2"], p["m2"], p["v2"])


if __name__ == "__main__":
    up_in_c, bypass_c = 16, 16
    c_in = up_in_c + bypass_c            # 32
    c_out = c_in // 2                    # 16
    n, h, w = 2, 16, 16                  # bypass (hook output) spatial size
    hx, wx = 8, 8                        # coarse decoder input, upsampled 2x

    key = jax.random.PRNGKey(0)
    kx, kb, kw1, kb1, kw2, kb2, kbn = jax.random.split(key, 7)

    x = jax.random.normal(kx, (n, up_in_c, hx, wx), jnp.float32)
    bypass = jax.random.normal(kb, (n, bypass_c, h, w), jnp.float32)

    def conv_init(kw_key, kb_key, cin, cout):
        bound = 1.0 / jnp.sqrt(jnp.float32(cin * 9))       # kaiming-uniform-like
        wgt = jax.random.uniform(kw_key, (cout, cin, 3, 3), jnp.float32, -bound, bound)
        b = jax.random.uniform(kb_key, (cout,), jnp.float32, -bound, bound)
        return wgt, b

    w1, b1 = conv_init(kw1, kb1, c_in, c_out)
    w2, b2 = conv_init(kw2, kb2, c_out, c_out)

    kg1, kbe1, km1, kv1, kg2, kbe2, km2, kv2 = jax.random.split(kbn, 8)

    def bn_init(kg, kbe, km, kv, c):      # non-trivial eval-mode BN stats
        return (jax.random.uniform(kg, (c,), jnp.float32, 0.5, 1.5),
                0.1 * jax.random.normal(kbe, (c,), jnp.float32),
                0.1 * jax.random.normal(km, (c,), jnp.float32),
                jax.random.uniform(kv, (c,), jnp.float32, 0.5, 1.5))

    g1, be1, m1, v1 = bn_init(kg1, kbe1, km1, kv1, c_out)
    g2, be2, m2, v2 = bn_init(kg2, kbe2, km2, kv2, c_out)

    params = dict(w1=w1, b1=b1, g1=g1, be1=be1, m1=m1, v1=v1,
                  w2=w2, b2=b2, g2=g2, be2=be2, m2=m2, v2=v2)

    out = expansion_block_forward(x, bypass, params)
    out = jax.block_until_ready(out)
    assert out.shape == (n, c_out, h, w), out.shape

    ref = jax.block_until_ready(_reference(x, bypass, params))
    max_err = float(jnp.max(jnp.abs(out - ref)))
    assert jnp.allclose(out, ref, atol=1e-3, rtol=1e-3), f"max abs err {max_err}"

    print("KERNEL_OK")
</pallas_src>

<mosaic_0001>
module attributes {stable_mosaic.version = 11 : i64} {
  func.func @_gemm_bn_act_kernel(%arg0: i32, %arg1: memref<512x288xf32, #tpu.memory_space<vmem>>, %arg2: memref<288x128xf32, #tpu.memory_space<vmem>>, %arg3: memref<1x128xf32, #tpu.memory_space<vmem>>, %arg4: memref<1x128xf32, #tpu.memory_space<vmem>>, %arg5: memref<512x128xf32, #tpu.memory_space<vmem>>) attributes {dimension_semantics = [#tpu.dimension_semantics<parallel>], iteration_bounds = array<i64: 1>, scalar_prefetch = 0 : i64, scratch_operands = 0 : i64, tpu.core_type = #tpu.core_type<tc>, window_params = [{transform_indices = @transform_0, window_bounds = array<i64: 512, 288>}, {pipeline_mode = #tpu.pipeline_mode<synchronous>, transform_indices = @transform_1, window_bounds = array<i64: 288, 128>}, {pipeline_mode = #tpu.pipeline_mode<synchronous>, transform_indices = @transform_2, window_bounds = array<i64: 1, 128>}, {pipeline_mode = #tpu.pipeline_mode<synchronous>, transform_indices = @transform_3, window_bounds = array<i64: 1, 128>}, {transform_indices = @transform_4, window_bounds = array<i64: 512, 128>}]} {
    %c0 = arith.constant 0 : index
    %c0_0 = arith.constant 0 : index
    %0 = vector.load %arg1[%c0, %c0_0] : memref<512x288xf32, #tpu.memory_space<vmem>>, vector<512x288xf32>
    %cst = arith.constant 0.000000e+00 : f32
    %1 = vector.broadcast %cst : f32 to vector<512x288xf32>
    %2 = arith.cmpf oge, %0, %1 : vector<512x288xf32>
    %cst_1 = arith.constant 0.00999999977 : f32
    %3 = vector.broadcast %cst_1 : f32 to vector<512x288xf32>
    %4 = arith.mulf %3, %0 : vector<512x288xf32>
    %5 = arith.select %2, %0, %4 : vector<512x288xi1>, vector<512x288xf32>
    %c0_2 = arith.constant 0 : index
    %c0_3 = arith.constant 0 : index
    %6 = vector.load %arg2[%c0_2, %c0_3] : memref<288x128xf32, #tpu.memory_space<vmem>>, vector<288x128xf32>
    %cst_4 = arith.constant dense<0.000000e+00> : vector<512x128xf32>
    %7 = tpu.matmul %5, %6, %cst_4 {dimension_numbers = #tpu.dot_dimension_numbers<[1], [0], [0], [1], [0, 0, 1, 1], [], []>} : vector<512x288xf32>, vector<288x128xf32>, vector<512x128xf32> -> vector<512x128xf32>
    %c0_5 = arith.constant 0 : index
    %c0_6 = arith.constant 0 : index
    %8 = vector.load %arg3[%c0_5, %c0_6] : memref<1x128xf32, #tpu.memory_space<vmem>>, vector<1x128xf32>
    %9 = vector.broadcast %8 : vector<1x128xf32> to vector<512x128xf32>
    %10 = arith.mulf %7, %9 : vector<512x128xf32>
    %c0_7 = arith.constant 0 : index
    %c0_8 = arith.constant 0 : index
    %11 = vector.load %arg4[%c0_7, %c0_8] : memref<1x128xf32, #tpu.memory_space<vmem>>, vector<1x128xf32>
    %12 = vector.broadcast %11 : vector<1x128xf32> to vector<512x128xf32>
    %13 = arith.addf %10, %12 : vector<512x128xf32>
    %cst_9 = arith.constant 0.000000e+00 : f32
    %14 = vector.broadcast %cst_9 : f32 to vector<512x128xf32>
    %15 = arith.cmpf oge, %13, %14 : vector<512x128xf32>
    %cst_10 = arith.constant 0.00999999977 : f32
    %16 = vector.broadcast %cst_10 : f32 to vector<512x128xf32>
    %17 = arith.mulf %16, %13 : vector<512x128xf32>
    %18 = arith.select %15, %13, %17 : vector<512x128xi1>, vector<512x128xf32>
    %c0_11 = arith.constant 0 : index
    %c0_12 = arith.constant 0 : index
    %19 = vector.load %arg5[%c0_11, %c0_12] : memref<512x128xf32, #tpu.memory_space<vmem>>, vector<512x128xf32>
    tpu.vector_store %arg5[%c0_11, %c0_12], %18 {strides = array<i32>} : memref<512x128xf32, #tpu.memory_space<vmem>>, vector<512x128xf32>,
    return
  }
  func.func @transform_0(%arg0: i32) -> (i32, i32) {
    %c0_i32 = arith.constant 0 : i32
    %c0_i32_0 = arith.constant 0 : i32
    return %arg0, %c0_i32 : i32, i32
  }
  func.func @transform_1(%arg0: i32) -> (i32, i32) {
    %c0_i32 = arith.constant 0 : i32
    %c0_i32_0 = arith.constant 0 : i32
    %c0_i32_1 = arith.constant 0 : i32
    return %c0_i32, %c0_i32_0 : i32, i32
  }
  func.func @transform_2(%arg0: i32) -> (i32, i32) {
    %c0_i32 = arith.constant 0 : i32
    %c0_i32_0 = arith.constant 0 : i32
    %c0_i32_1 = arith.constant 0 : i32
    return %c0_i32, %c0_i32_0 : i32, i32
  }
  func.func @transform_3(%arg0: i32) -> (i32, i32) {
    %c0_i32 = arith.constant 0 : i32
    %c0_i32_0 = arith.constant 0 : i32
    %c0_i32_1 = arith.constant 0 : i32
    return %c0_i32, %c0_i32_0 : i32, i32
  }
  func.func @transform_4(%arg0: i32) -> (i32, i32) {
    %c0_i32 = arith.constant 0 : i32
    %c0_i32_0 = arith.constant 0 : i32
    return %arg0, %c0_i32 : i32, i32
  }
}

</mosaic_0001>

<bundles_post_ra>
// kernel: tpu_custom_call.1
= control target key start
LH: loop header
LB: loop body
LE: loop exit
PB: predicated region body
PF: predicated region fallthrough
CT: control target
= control target key end

     0   :  { %vm822_vm1 = vcmask 261120   ;;  %s3393_s0 = inlined_call_operand.vmem [shape: f32[512,288], index: 0, kind: input, shape index: {}]   ;;  %s3394_s1 = inlined_call_operand.vmem [shape: f32[288,128], index: 1, kind: input, shape index: {}]   ;;  %s3395_s2 = inlined_call_operand.vmem [shape: f32[1,128], index: 2, kind: input, shape index: {}]   ;;  %s3396_s3 = inlined_call_operand.vmem [shape: f32[1,128], index: 3, kind: input, shape index: {}]   ;;  %s3397_s4 = inlined_call_operand.hbm [shape: f32[512,128], index: 4, kind: output, shape index: {}]  }
   0x1   :  { %v801_v0 = vld [vmem:[%s3394_s1 + $0x78] sm:$0xff]  ;;  %v800_v3 = vld [vmem:[%s3394_s1 + $0x70] sm:$0xff]  ;;  %v799_v6 = vld [vmem:[%s3394_s1 + $0x68] sm:$0xff] }
   0x2   :  { %v2221_v1 = vld [vmem:[%s3394_s1 + $0xf8] sm:$0xff]  ;;  %1015 = vmatpush.msra.mxu0 %v801_v0  ;;  %2116 = vmatpush.msra.mxu3 %v801_v0  ;;  %v2234_v4 = vld [vmem:[%s3394_s1 + $0xf0] sm:$0xff]  ;;  %v2249_v7 = vld [vmem:[%s3394_s1 + $0xe8] sm:$0xff] }
   0x3   :  { %v2226_v2 = vld [vmem:[%s3394_s1 + $0x118] sm:$0xff]  ;;  %v2239_v5 = vld [vmem:[%s3394_s1 + $0x110] sm:$0xff]  ;;  %1224 = vmatpush.msra.mxu1 %v2221_v1  ;;  %v2254_v8 = vld [vmem:[%s3394_s1 + $0x108] sm:$0xff] }
   0x4   :  { %1445 = vmatpush.msra.mxu2 %v2226_v2  ;;  %1016 = vmatpush.msra.mxu0 %v800_v3  ;;  %v798_v9 = vld [vmem:[%s3394_s1 + $0x60] sm:$0xff]  ;;  %v20_v10 = vld [vmem:[%s3393_s0 + $0x10] sm:$0xff]  ;;  %v797_v14 = vld [vmem:[%s3394_s1 + $0x58] sm:$0xff] }
   0x5   :  { %2117 = vmatpush.msra.mxu3 %v800_v3  ;;  %1225 = vmatpush.msra.mxu1 %v2234_v4  ;;  %v2267_v11 = vld [vmem:[%s3394_s1 + $0xe0] sm:$0xff]  ;;  %vm212_vm0 = vcmp.ge.f32.partialorder %v20_v10, 0.0  ;;  %v404_v13 = vmul.f32 0.01, %v20_v10  ;;  %v2282_v16 = vld [vmem:[%s3394_s1 + $0xd8] sm:$0xff]  ;;  %v23_v17 = vld [vmem:[%s3393_s0 + $0x28] sm:$0xff] }
   0x6   :  { %1446 = vmatpush.msra.mxu2 %v2239_v5  ;;  %1017 = vmatpush.msra.mxu0 %v799_v6  ;;  %v2272_v12 = vld [vmem:[%s3394_s1 + $0x100] sm:$0xff]  ;;  %v796_v18 = vld [vmem:[%s3394_s1 + $0x50] sm:$0xff]  ;;  %v795_v20 = vld [vmem:[%s3394_s1 + $0x48] sm:$0xff]  ;;  %v407_v21 = vmul.f32 0.01, %v23_v17  ;;  %vm215_vm2 = vcmp.ge.f32.partialorder %v23_v17, 0.0 }
   0x7   :  { %2118 = vmatpush.msra.mxu3 %v799_v6  ;;  %1226 = vmatpush.msra.mxu1 %v2249_v7  ;;  %v596_v15 = vsel %vm212_vm0, %v20_v10, %v404_v13  ;;  %v2296_v19 = vld [vmem:[%s3394_s1 + $0xd0] sm:$0xff]  ;;  %v2305_v22 = vld [vmem:[%s3394_s1 + $0xc8] sm:$0xff]  ;;  %v794_v23 = vld [vmem:[%s3394_s1 + $0x40] sm:$0xff] }
   0x8   :  { %1447 = vmatpush.msra.mxu2 %v2254_v8  ;;  %1018 = vmatpush.msra.mxu0 %v798_v9  ;;  %v2314_v24 = vld [vmem:[%s3394_s1 + $0xc0] sm:$0xff]  ;;  %v599_v25 = vsel %vm215_vm2, %v23_v17, %v407_v21  ;;  %v793_v26 = vld [vmem:[%s3394_s1 + $0x38] sm:$0xff]  ;;  %v792_v29 = vld [vmem:[%s3394_s1 + $0x30] sm:$0xff] }
   0x9   :  { %2119 = vmatpush.msra.mxu3 %v798_v9  ;;  %1227 = vmatpush.msra.mxu1 %v2267_v11  ;;  %v2323_v27 = vld [vmem:[%s3394_s1 + $0xb8] sm:$0xff]  ;;  %v26_v28 = vld [vmem:[%s3393_s0 + $0x40] sm:$0xff]  ;;  %v2336_v30 = vld [vmem:[%s3394_s1 + $0xb0] sm:$0xff] }
   0xa   :  { %1448 = vmatpush.msra.mxu2 %v2272_v12  ;;  %1019 = vmatpush.msra.mxu0 %v797_v14  ;;  %v791_v31 = vld [vmem:[%s3394_s1 + $0x28] sm:$0xff]  ;;  %v410_v32 = vmul.f32 0.01, %v26_v28  ;;  %vm218_vm3 = vcmp.ge.f32.partialorder %v26_v28, 0.0  ;;  %v790_v34 = vld [vmem:[%s3394_s1 + $0x20] sm:$0xff]  ;;  %v789_v37 = vld [vmem:[%s3394_s1 + $0x18] sm:$0xff] }
   0xb   :  { %2052 = vmatmul.msk.f32.vlgmr.msra.gmra.mxu2 %vm822_vm1, %v596_v15  ;;  %2120 = vmatpush.msra.mxu3 %v797_v14  ;;  %v2345_v33 = vld [vmem:[%s3394_s1 + $0xa8] sm:$0xff]  ;;  %v2354_v35 = vld [vmem:[%s3394_s1 + $0xa0] sm:$0xff]  ;;  %v2363_v38 = vld [vmem:[%s3394_s1 + $0x98] sm:$0xff] }
   0xc   :  { %1228 = vmatpush.msra.mxu1 %v2282_v16  ;;  %1020 = vmatpush.msra.mxu0 %v796_v18  ;;  %v602_v36 = vsel %vm218_vm3, %v26_v28, %v410_v32  ;;  %v788_v39 = vld [vmem:[%s3394_s1 + $0x10] sm:$0xff]  ;;  %v18_v40 = vld [vmem:[%s3393_s0] sm:$0xff]  ;;  %v19_v42 = vld [vmem:[%s3393_s0 + $0x8] sm:$0xff] }
   0xd   :  { %2121 = vmatpush.msra.mxu3 %v796_v18  ;;  %v162_v41 = vld [vmem:[%s3393_s0 + $0x480] sm:$0xff]  ;;  %v29_v43 = vld [vmem:[%s3393_s0 + $0x58] sm:$0xff]  ;;  %v2385_v44 = vld [vmem:[%s3394_s1 + $0x90] sm:$0xff] }
   0xe   :  { %1229 = vmatpush.msra.mxu1 %v2296_v19  ;;  %1021 = vmatpush.msra.mxu0 %v795_v20 }
   0xf   :  { %2122 = vmatpush.msra.mxu3 %v795_v20 }
  0x10   :  { %1230 = vmatpush.msra.mxu1 %v2305_v22  ;;  %1022 = vmatpush.msra.mxu0 %v794_v23 }
  0x11   :  { %2123 = vmatpush.msra.mxu3 %v794_v23 }
  0x12   :  { %1231 = vmatpush.msra.mxu1 %v2314_v24  ;;  %1023 = vmatpush.msra.mxu0 %v793_v26 }
  0x13   :  { %2053 = vmatmul.msk.f32.gmra.mxu2 %vm822_vm1, %v599_v25  ;;  %2124 = vmatpush.msra.mxu3 %v793_v26 }
  0x14   :  { %1232 = vmatpush.msra.mxu1 %v2323_v27  ;;  %1024 = vmatpush.msra.mxu0 %v792_v29 }
  0x15   :  { %2125 = vmatpush.msra.mxu3 %v792_v29 }
  0x16   :  { %1233 = vmatpush.msra.mxu1 %v2336_v30  ;;  %1025 = vmatpush.msra.mxu0 %v791_v31 }
  0x17   :  { %2126 = vmatpush.msra.mxu3 %v791_v31 }
  0x18   :  { %1234 = vmatpush.msra.mxu1 %v2345_v33  ;;  %1026 = vmatpush.msra.mxu0 %v790_v34 }
  0x19   :  { %2127 = vmatpush.msra.mxu3 %v790_v34 }
  0x1a   :  { %1235 = vmatpush.msra.mxu1 %v2354_v35  ;;  %1027 = vmatpush.msra.mxu0 %v789_v37 }
  0x1b   :  { %2054 = vmatmul.msk.f32.gmra.mxu2 %vm822_vm1, %v602_v36 }
  0x1c   :  { %9 = vsyncpa [#allocation3], 0  ;;  %2128 = vmatpush.msra.mxu3 %v789_v37  ;;  %1236 = vmatpush.msra.mxu1 %v2363_v38  ;;  %v787_v45 = vld [vmem:[%s3394_s1 + $0x8] sm:$0xff]  ;;  %v402_v47 = vmul.f32 0.01, %v18_v40  ;;  %vm210_vm4 = vcmp.ge.f32.partialorder %v18_v40, 0.0 }
  0x1d   :  { %v2394_v46 = vld [vmem:[%s3394_s1 + $0x88] sm:$0xff]  ;;  %v546_v48 = vmul.f32 0.01, %v162_v41  ;;  %1028 = vmatpush.msra.mxu0 %v788_v39  ;;  %vm354_vm5 = vcmp.ge.f32.partialorder %v162_v41, 0.0  ;;  %v403_v49 = vmul.f32 0.01, %v19_v42 }
  0x1e   :  { %v413_v50 = vmul.f32 0.01, %v29_v43  ;;  %2129 = vmatpush.msra.mxu3 %v788_v39  ;;  %1237 = vmatpush.msra.mxu1 %v2385_v44  ;;  %v786_v51 = vld [vmem:[%s3394_s1] sm:$0xff]  ;;  %vm211_vm6 = vcmp.ge.f32.partialorder %v19_v42, 0.0  ;;  %vm221_vm7 = vcmp.ge.f32.partialorder %v29_v43, 0.0  ;;  %v594_v53 = vsel %vm210_vm4, %v18_v40, %v402_v47  ;;  %v21_v57 = vld [vmem:[%s3393_s0 + $0x18] sm:$0xff] }
  0x1f   :  { %1029 = vmatpush.msra.mxu0 %v787_v45  ;;  %v2403_v52 = vld [vmem:[%s3394_s1 + $0x80] sm:$0xff]  ;;  %v738_v54 = vsel %vm354_vm5, %v162_v41, %v546_v48  ;;  %v595_v55 = vsel %vm211_vm6, %v19_v42, %v403_v49  ;;  %v165_v58 = vld [vmem:[%s3393_s0 + $0x498] sm:$0xff]  ;;  %v32_v60 = vld [vmem:[%s3393_s0 + $0x70] sm:$0xff]  ;;  %v405_v61 = vmul.f32 0.01, %v21_v57  ;;  %vm213_vm8 = vcmp.ge.f32.partialorder %v21_v57, 0.0 }
  0x20   :  { %2130 = vmatpush.msra.mxu3 %v787_v45  ;;  %1238 = vmatpush.msra.mxu1 %v2394_v46  ;;  %v605_v56 = vsel %vm221_vm7, %v29_v43, %v413_v50  ;;  %v22_v59 = vld [vmem:[%s3393_s0 + $0x20] sm:$0xff]  ;;  %v549_v62 = vmul.f32 0.01, %v165_v58  ;;  %vm357_vm9 = vcmp.ge.f32.partialorder %v165_v58, 0.0  ;;  %v416_v0 = vmul.f32 0.01, %v32_v60 }
  0x21   :  { %1030 = vmatpush.msra.mxu0 %v786_v51  ;;  %v406_v63 = vmul.f32 0.01, %v22_v59  ;;  %vm214_vm10 = vcmp.ge.f32.partialorder %v22_v59, 0.0  ;;  %vm224_vm11 = vcmp.ge.f32.partialorder %v32_v60, 0.0  ;;  %v597_v3 = vsel %vm213_vm8, %v21_v57, %v405_v61  ;;  %v24_v13 = vld [vmem:[%s3393_s0 + $0x30] sm:$0xff]  ;;  %v27_v26 = vld [vmem:[%s3393_s0 + $0x48] sm:$0xff] }
  0x22   :  { %2131 = vmatpush.msra.mxu3 %v786_v51  ;;  %1239 = vmatpush.msra.mxu1 %v2403_v52  ;;  %v741_v6 = vsel %vm357_vm9, %v165_v58, %v549_v62  ;;  %v608_v10 = vsel %vm224_vm11, %v32_v60, %v416_v0  ;;  %v168_v14 = vld [vmem:[%s3393_s0 + $0x4b0] sm:$0xff]  ;;  %v408_v15 = vmul.f32 0.01, %v24_v13  ;;  %vm216_vm12 = vcmp.ge.f32.partialorder %v24_v13, 0.0  ;;  %v171_v28 = vld [vmem:[%s3393_s0 + $0x4c8] sm:$0xff]  ;;  %v30_v40 = vld [vmem:[%s3393_s0 + $0x60] sm:$0xff] }
  0x23   :  { %1031 = vmatmul.f32.vlgmr.msra.gmra.mxu0 %v594_v53  ;;  %1175 = vmatmul.f32.vlgmr.msra.gmra.mxu3 %v738_v54  ;;  %v598_v9 = vsel %vm214_vm10, %v22_v59, %v406_v63  ;;  %v552_v17 = vmul.f32 0.01, %v168_v14  ;;  %vm360_vm13 = vcmp.ge.f32.partialorder %v168_v14, 0.0  ;;  %v411_v29 = vmul.f32 0.01, %v27_v26  ;;  %v174_v41 = vld [vmem:[%s3393_s0 + $0x4e0] sm:$0xff] }
  0x24   :  { %1240 = vmatmul.f32.vlgmr.msra.gmra.mxu1 %v595_v55  ;;  %2055 = vmatmul.msk.f32.gmra.mxu2 %vm822_vm1, %v605_v56  ;;  %v555_v31 = vmul.f32 0.01, %v171_v28  ;;  %vm219_vm0 = vcmp.ge.f32.partialorder %v27_v26, 0.0  ;;  %vm363_vm2 = vcmp.ge.f32.partialorder %v171_v28, 0.0  ;;  %v414_v42 = vmul.f32 0.01, %v30_v40 }
  0x25   :  { %2132 = vmatpush.msrb.mxu3 %v2221_v1  ;;  %v25_v1 = vld [vmem:[%s3393_s0 + $0x38] sm:$0xff]  ;;  %v744_v21 = vsel %vm360_vm13, %v168_v14, %v552_v17  ;;  %v558_v43 = vmul.f32 0.01, %v174_v41  ;;  %vm222_vm5 = vcmp.ge.f32.partialorder %v30_v40, 0.0  ;;  %vm366_vm6 = vcmp.ge.f32.partialorder %v174_v41, 0.0  ;;  %v36_v61 = vld [vmem:[%s3393_s0 + $0x90] sm:$0xff] }
  0x26   :  { %v409_v18 = vmul.f32 0.01, %v25_v1  ;;  %vm217_vm14 = vcmp.ge.f32.partialorder %v25_v1, 0.0  ;;  %v747_v36 = vsel %vm363_vm2, %v171_v28, %v555_v31  ;;  %v33_v51 = vld [vmem:[%s3393_s0 + $0x78] sm:$0xff]  ;;  %v180_v62 = vld [vmem:[%s3393_s0 + $0x510] sm:$0xff]  ;;  %vm228_vm13 = vcmp.ge.f32.partialorder %v36_v61, 0.0 }
  0x27   :  { %2133 = vmatpush.msrb.mxu3 %v2234_v4  ;;  %v35_v4 = vld [vmem:[%s3393_s0 + $0x88] sm:$0xff]  ;;  %v750_v48 = vsel %vm366_vm6, %v174_v41, %v558_v43  ;;  %v177_v53 = vld [vmem:[%s3393_s0 + $0x4f8] sm:$0xff]  ;;  %v417_v54 = vmul.f32 0.01, %v33_v51  ;;  %vm225_vm9 = vcmp.ge.f32.partialorder %v33_v51, 0.0  ;;  %s2040_s27 = sshll.u32 %s3397_s4, 4  ;;  %s2041_s27 = int_to_ptr.hbm [resolvable:$true] %s2040_s27 }
  0x28   :  { %v419_v20 = vmul.f32 0.01, %v35_v4  ;;  %vm227_vm15 = vcmp.ge.f32.partialorder %v35_v4, 0.0  ;;  %v601_v23 = vsel %vm217_vm14, %v25_v1, %v409_v18  ;;  %v561_v55 = vmul.f32 0.01, %v177_v53  ;;  %v39_v14 = vld [vmem:[%s3393_s0 + $0xa8] sm:$0xff] }
  0x29   :  { %2134 = vmatpush.msrb.mxu3 %v2249_v7  ;;  %v600_v7 = vsel %vm216_vm12, %v24_v13, %v408_v15  ;;  %vm369_vm10 = vcmp.ge.f32.partialorder %v177_v53, 0.0  ;;  %v420_v63 = vmul.f32 0.01, %v36_v61  ;;  %v564_v0 = vmul.f32 0.01, %v180_v62  ;;  %v183_v1 = vld [vmem:[%s3393_s0 + $0x528] sm:$0xff] }
  0x2a   :  { %v611_v25 = vsel %vm227_vm15, %v35_v4, %v419_v20  ;;  %v753_v58 = vsel %vm369_vm10, %v177_v53, %v561_v55  ;;  %vm372_vm14 = vcmp.ge.f32.partialorder %v180_v62, 0.0  ;;  %v567_v4 = vmul.f32 0.01, %v183_v1  ;;  %s2188_s28 = smov 128   ;;  %s2189_s29 = smov 8  }
  0x2b   :  { %1034 = vmatmul.f32.gmra.mxu0 %v597_v3  ;;  %1178 = vmatmul.f32.gmra.mxu3 %v741_v6  ;;  %vm231_vm2 = vcmp.ge.f32.partialorder %v39_v14, 0.0 }
  0x2c   :  { %1243 = vmatmul.f32.gmra.mxu1 %v598_v9  ;;  %2056 = vmatmul.msk.f32.gmra.mxu2 %vm822_vm1, %v608_v10  ;;  %v756_v9 = vsel %vm372_vm14, %v180_v62, %v564_v0 }
  0x2d   :  { %2135 = vmatpush.msrb.mxu3 %v2267_v11  ;;  %v28_v11 = vld [vmem:[%s3393_s0 + $0x50] sm:$0xff] }
  0x2e   :  { %v412_v32 = vmul.f32 0.01, %v28_v11  ;;  %vm220_vm3 = vcmp.ge.f32.partialorder %v28_v11, 0.0 }
  0x2f   :  { %2136 = vmatpush.msrb.mxu3 %v2282_v16  ;;  %v38_v16 = vld [vmem:[%s3393_s0 + $0xa0] sm:$0xff] }
  0x30   :  { %v422_v34 = vmul.f32 0.01, %v38_v16  ;;  %vm230_vm4 = vcmp.ge.f32.partialorder %v38_v16, 0.0  ;;  %v604_v37 = vsel %vm220_vm3, %v28_v11, %v412_v32  ;;  %vm375_vm3 = vcmp.ge.f32.partialorder %v183_v1, 0.0 }
  0x31   :  { %2137 = vmatpush.msrb.mxu3 %v2296_v19  ;;  %v603_v19 = vsel %vm219_vm0, %v27_v26, %v411_v29  ;;  %v759_v20 = vsel %vm375_vm3, %v183_v1, %v567_v4 }
  0x32   :  { %v614_v39 = vsel %vm230_vm4, %v38_v16, %v422_v34 }
  0x33   :  { %1037 = vmatmul.f32.gmra.mxu0 %v600_v7  ;;  %1181 = vmatmul.f32.gmra.mxu3 %v744_v21 }
  0x34   :  { %1246 = vmatmul.f32.gmra.mxu1 %v601_v23  ;;  %2057 = vmatmul.msk.f32.gmra.mxu2 %vm822_vm1, %v611_v25  ;;  %v186_v23 = vld [vmem:[%s3393_s0 + $0x540] sm:$0xff]  ;;  %v43_v25 = vld [vmem:[%s3393_s0 + $0xc8] sm:$0xff] }
  0x35   :  { %2138 = vmatpush.msrb.mxu3 %v2305_v22  ;;  %v31_v22 = vld [vmem:[%s3393_s0 + $0x68] sm:$0xff]  ;;  %v570_v28 = vmul.f32 0.01, %v186_v23  ;;  %v427_v11 = vmul.f32 0.01, %v43_v25 }
  0x36   :  { %v415_v45 = vmul.f32 0.01, %v31_v22  ;;  %vm223_vm7 = vcmp.ge.f32.partialorder %v31_v22, 0.0 }
  0x37   :  { %2139 = vmatpush.msrb.mxu3 %v2314_v24  ;;  %v41_v24 = vld [vmem:[%s3393_s0 + $0xb8] sm:$0xff] }
  0x38   :  { %v425_v47 = vmul.f32 0.01, %v41_v24  ;;  %vm233_vm8 = vcmp.ge.f32.partialorder %v41_v24, 0.0  ;;  %v607_v49 = vsel %vm223_vm7, %v31_v22, %v415_v45  ;;  %vm378_vm7 = vcmp.ge.f32.partialorder %v186_v23, 0.0 }
  0x39   :  { %2140 = vmatpush.msrb.mxu3 %v2323_v27  ;;  %v606_v27 = vsel %vm222_vm5, %v30_v40, %v414_v42  ;;  %v762_v31 = vsel %vm378_vm7, %v186_v23, %v570_v28 }
  0x3a   :  { %v617_v50 = vsel %vm233_vm8, %v41_v24, %v425_v47  ;;  %vm235_vm8 = vcmp.ge.f32.partialorder %v43_v25, 0.0 }
  0x3b   :  { %1040 = vmatmul.f32.gmra.mxu0 %v603_v19  ;;  %1184 = vmatmul.f32.gmra.mxu3 %v747_v36  ;;  %v619_v32 = vsel %vm235_vm8, %v43_v25, %v427_v11  ;;  %v45_v19 = vld [vmem:[%s3393_s0 + $0xd8] sm:$0xff] }
  0x3c   :  { %1249 = vmatmul.f32.gmra.mxu1 %v604_v37  ;;  %2058 = vmatmul.msk.f32.gmra.mxu2 %vm822_vm1, %v614_v39  ;;  %v189_v36 = vld [vmem:[%s3393_s0 + $0x558] sm:$0xff]  ;;  %v46_v37 = vld [vmem:[%s3393_s0 + $0xe0] sm:$0xff]  ;;  %v56_v39 = vld [vmem:[%s3393_s0 + $0x130] sm:$0xff]  ;;  %v429_v40 = vmul.f32 0.01, %v45_v19  ;;  %vm237_vm10 = vcmp.ge.f32.partialorder %v45_v19, 0.0 }
  0x3d   :  { %2141 = vmatpush.msrb.mxu3 %v2336_v30  ;;  %v34_v30 = vld [vmem:[%s3393_s0 + $0x80] sm:$0xff]  ;;  %v573_v41 = vmul.f32 0.01, %v189_v36  ;;  %v430_v22 = vmul.f32 0.01, %v46_v37 }
  0x3e   :  { %v418_v56 = vmul.f32 0.01, %v34_v30  ;;  %vm226_vm11 = vcmp.ge.f32.partialorder %v34_v30, 0.0  ;;  %v440_v24 = vmul.f32 0.01, %v56_v39  ;;  %v621_v42 = vsel %vm237_vm10, %v45_v19, %v429_v40 }
  0x3f   :  { %2142 = vmatpush.msrb.mxu3 %v2345_v33  ;;  %v44_v33 = vld [vmem:[%s3393_s0 + $0xd0] sm:$0xff] }
  0x40   :  { %v428_v57 = vmul.f32 0.01, %v44_v33  ;;  %vm236_vm12 = vcmp.ge.f32.partialorder %v44_v33, 0.0  ;;  %v610_v59 = vsel %vm226_vm11, %v34_v30, %v418_v56  ;;  %vm381_vm11 = vcmp.ge.f32.partialorder %v189_v36, 0.0 }
  0x41   :  { %2143 = vmatpush.msrb.mxu3 %v2354_v35  ;;  %v609_v35 = vsel %vm225_vm9, %v33_v51, %v417_v54  ;;  %v765_v43 = vsel %vm381_vm11, %v189_v36, %v573_v41 }
  0x42   :  { %v620_v60 = vsel %vm236_vm12, %v44_v33, %v428_v57  ;;  %vm238_vm12 = vcmp.ge.f32.partialorder %v46_v37, 0.0 }
  0x43   :  { %1043 = vmatmul.f32.gmra.mxu0 %v606_v27  ;;  %1187 = vmatmul.f32.gmra.mxu3 %v750_v48  ;;  %v622_v45 = vsel %vm238_vm12, %v46_v37, %v430_v22  ;;  %v48_v27 = vld [vmem:[%s3393_s0 + $0xf0] sm:$0xff] }
  0x44   :  { %1252 = vmatmul.f32.gmra.mxu1 %v607_v49  ;;  %2059 = vmatmul.msk.f32.gmra.mxu2 %vm822_vm1, %v617_v50  ;;  %v192_v48 = vld [vmem:[%s3393_s0 + $0x570] sm:$0xff]  ;;  %v49_v49 = vld [vmem:[%s3393_s0 + $0xf8] sm:$0xff]  ;;  %v59_v50 = vld [vmem:[%s3393_s0 + $0x148] sm:$0xff]  ;;  %v432_v51 = vmul.f32 0.01, %v48_v27  ;;  %vm240_vm14 = vcmp.ge.f32.partialorder %v48_v27, 0.0 }
  0x45   :  { %2144 = vmatpush.msrb.mxu3 %v2363_v38  ;;  %v37_v38 = vld [vmem:[%s3393_s0 + $0x98] sm:$0xff]  ;;  %v576_v53 = vmul.f32 0.01, %v192_v48  ;;  %v433_v30 = vmul.f32 0.01, %v49_v49 }
  0x46   :  { %v421_v3 = vmul.f32 0.01, %v37_v38  ;;  %vm229_vm15 = vcmp.ge.f32.partialorder %v37_v38, 0.0  ;;  %v443_v33 = vmul.f32 0.01, %v59_v50  ;;  %v624_v54 = vsel %vm240_vm14, %v48_v27, %v432_v51  ;;  %v74_v27 = vld [vmem:[%s3393_s0 + $0x1c0] sm:$0xff] }
  0x47   :  { %2145 = vmatpush.msrb.mxu3 %v2385_v44  ;;  %v47_v44 = vld [vmem:[%s3393_s0 + $0xe8] sm:$0xff]  ;;  %v458_v51 = vmul.f32 0.01, %v74_v27 }
  0x48   :  { %v431_v6 = vmul.f32 0.01, %v47_v44  ;;  %vm239_vm0 = vcmp.ge.f32.partialorder %v47_v44, 0.0  ;;  %v613_v10 = vsel %vm229_vm15, %v37_v38, %v421_v3  ;;  %vm384_vm15 = vcmp.ge.f32.partialorder %v192_v48, 0.0 }
  0x49   :  { %2146 = vmatpush.msrb.mxu3 %v2394_v46  ;;  %v612_v46 = vsel %vm228_vm13, %v36_v61, %v420_v63  ;;  %vm248_vm13 = vcmp.ge.f32.partialorder %v56_v39, 0.0  ;;  %v768_v55 = vsel %vm384_vm15, %v192_v48, %v576_v53 }
  0x4a   :  { %v623_v13 = vsel %vm239_vm0, %v47_v44, %v431_v6  ;;  %v632_v47 = vsel %vm248_vm13, %v56_v39, %v440_v24  ;;  %vm241_vm0 = vcmp.ge.f32.partialorder %v49_v49, 0.0 }
  0x4b   :  { %1046 = vmatmul.f32.gmra.mxu0 %v609_v35  ;;  %1190 = vmatmul.f32.gmra.mxu3 %v753_v58  ;;  %v625_v56 = vsel %vm241_vm0, %v49_v49, %v433_v30  ;;  %v51_v35 = vld [vmem:[%s3393_s0 + $0x108] sm:$0xff] }
  0x4c   :  { %1255 = vmatmul.f32.gmra.mxu1 %v610_v59  ;;  %2060 = vmatmul.msk.f32.gmra.mxu2 %vm822_vm1, %v620_v60  ;;  %v195_v58 = vld [vmem:[%s3393_s0 + $0x588] sm:$0xff]  ;;  %v52_v59 = vld [vmem:[%s3393_s0 + $0x110] sm:$0xff]  ;;  %v62_v60 = vld [vmem:[%s3393_s0 + $0x160] sm:$0xff]  ;;  %v435_v61 = vmul.f32 0.01, %v51_v35  ;;  %vm243_vm3 = vcmp.ge.f32.partialorder %v51_v35, 0.0 }
  0x4d   :  { %2147 = vmatpush.msrb.mxu3 %v2403_v52  ;;  %v40_v52 = vld [vmem:[%s3393_s0 + $0xb0] sm:$0xff]  ;;  %v579_v62 = vmul.f32 0.01, %v195_v58  ;;  %v436_v38 = vmul.f32 0.01, %v52_v59 }
  0x4e   :  { %v424_v15 = vmul.f32 0.01, %v40_v52  ;;  %vm232_vm4 = vcmp.ge.f32.partialorder %v40_v52, 0.0  ;;  %v446_v44 = vmul.f32 0.01, %v62_v60  ;;  %v627_v63 = vsel %vm243_vm3, %v51_v35, %v435_v61  ;;  %v67_v35 = vld [vmem:[%s3393_s0 + $0x188] sm:$0xff] }
  0x4f   :  { %2148 = vmatpush.msra.mxu3 %v2226_v2  ;;  %v50_v2 = vld [vmem:[%s3393_s0 + $0x100] sm:$0xff]  ;;  %v451_v61 = vmul.f32 0.01, %v67_v35 }
  0x50   :  { %v434_v17 = vmul.f32 0.01, %v50_v2  ;;  %vm242_vm5 = vcmp.ge.f32.partialorder %v50_v2, 0.0  ;;  %v616_v7 = vsel %vm232_vm4, %v40_v52, %v424_v15  ;;  %vm387_vm4 = vcmp.ge.f32.partialorder %v195_v58, 0.0 }
  0x51   :  { %2149 = vmatpush.msra.mxu3 %v2239_v5  ;;  %v423_v5 = vmul.f32 0.01, %v39_v14  ;;  %v771_v0 = vsel %vm387_vm4, %v195_v58, %v579_v62  ;;  %v77_v58 = vld [vmem:[%s3393_s0 + $0x1d8] sm:$0xff] }
  0x52   :  { %v626_v21 = vsel %vm242_vm5, %v50_v2, %v434_v17  ;;  %vm244_vm5 = vcmp.ge.f32.partialorder %v52_v59, 0.0  ;;  %v461_v62 = vmul.f32 0.01, %v77_v58 }
  0x53   :  { %2150 = vmatpush.msra.mxu3 %v2254_v8  ;;  %1049 = vmatmul.f32.gmra.mxu0 %v612_v46  ;;  %v615_v18 = vsel %vm231_vm2, %v39_v14, %v423_v5  ;;  %v42_v8 = vld [vmem:[%s3393_s0 + $0xc0] sm:$0xff]  ;;  %vm251_vm2 = vcmp.ge.f32.partialorder %v59_v50, 0.0  ;;  %v628_v3 = vsel %vm244_vm5, %v52_v59, %v436_v38 }
  0x54   :  { %1193 = vmatmul.f32.gmra.mxu3 %v756_v9  ;;  %1258 = vmatmul.f32.gmra.mxu1 %v613_v10  ;;  %v426_v26 = vmul.f32 0.01, %v42_v8  ;;  %vm234_vm6 = vcmp.ge.f32.partialorder %v42_v8, 0.0  ;;  %v635_v57 = vsel %vm251_vm2, %v59_v50, %v443_v33  ;;  %v54_v46 = vld [vmem:[%s3393_s0 + $0x120] sm:$0xff]  ;;  %v55_v10 = vld [vmem:[%s3393_s0 + $0x128] sm:$0xff] }
  0x55   :  { %2061 = vmatmul.msk.f32.gmra.mxu2 %vm822_vm1, %v623_v13  ;;  %2151 = vmatpush.msra.mxu3 %v2272_v12  ;;  %v53_v12 = vld [vmem:[%s3393_s0 + $0x118] sm:$0xff]  ;;  %v198_v9 = vld [vmem:[%s3393_s0 + $0x5a0] sm:$0xff]  ;;  %v438_v14 = vmul.f32 0.01, %v54_v46  ;;  %vm246_vm7 = vcmp.ge.f32.partialorder %v54_v46, 0.0 }
  0x56   :  { %v437_v16 = vmul.f32 0.01, %v53_v12  ;;  %vm245_vm9 = vcmp.ge.f32.partialorder %v53_v12, 0.0  ;;  %v618_v29 = vsel %vm234_vm6, %v42_v8, %v426_v26  ;;  %vm254_vm6 = vcmp.ge.f32.partialorder %v62_v60, 0.0  ;;  %v65_v13 = vld [vmem:[%s3393_s0 + $0x178] sm:$0xff] }
  0x57   :  { %v638_v6 = vsel %vm254_vm6, %v62_v60, %v446_v44  ;;  %v582_v1 = vmul.f32 0.01, %v198_v9  ;;  %vm390_vm8 = vcmp.ge.f32.partialorder %v198_v9, 0.0  ;;  %v439_v52 = vmul.f32 0.01, %v55_v10 }
  0x58   :  { %v629_v34 = vsel %vm245_vm9, %v53_v12, %v437_v16  ;;  %v449_v2 = vmul.f32 0.01, %v65_v13  ;;  %vm247_vm9 = vcmp.ge.f32.partialorder %v55_v10, 0.0  ;;  %vm257_vm10 = vcmp.ge.f32.partialorder %v65_v13, 0.0 }
  0x59   :  { %v630_v5 = vsel %vm246_vm7, %v54_v46, %v438_v14  ;;  %v774_v4 = vsel %vm390_vm8, %v198_v9, %v582_v1  ;;  %v631_v15 = vsel %vm247_vm9, %v55_v10, %v439_v52  ;;  %vm266_vm7 = vcmp.ge.f32.partialorder %v74_v27, 0.0  ;;  %v69_v9 = vld [vmem:[%s3393_s0 + $0x198] sm:$0xff]  ;;  %v166_v10 = vld [vmem:[%s3393_s0 + $0x4a0] sm:$0xff]  ;;  %v80_v52 = vld [vmem:[%s3393_s0 + $0x1f0] sm:$0xff] }
  0x5a   :  { %v641_v17 = vsel %vm257_vm10, %v65_v13, %v449_v2  ;;  %vm259_vm10 = vcmp.ge.f32.partialorder %v67_v35, 0.0  ;;  %v2648_v14 = vld [vmem:[%s3395_s2] ss:$0 sm:$0xff] }
  0x5b   :  { %1052 = vmatmul.f32.gmra.mxu0 %v615_v18  ;;  %v57_v18 = vld [vmem:[%s3393_s0 + $0x138] sm:$0xff]  ;;  %v70_v1 = vld [vmem:[%s3393_s0 + $0x1a0] sm:$0xff] }
  0x5c   :  { %1196 = vmatmul.f32.gmra.mxu3 %v759_v20  ;;  %1261 = vmatmul.f32.gmra.mxu1 %v616_v7  ;;  %v201_v20 = vld [vmem:[%s3393_s0 + $0x5b8] sm:$0xff]  ;;  %v58_v7 = vld [vmem:[%s3393_s0 + $0x140] sm:$0xff]  ;;  %v441_v8 = vmul.f32 0.01, %v57_v18  ;;  %vm249_vm11 = vcmp.ge.f32.partialorder %v57_v18, 0.0 }
  0x5d   :  { %2062 = vmatmul.msk.f32.gmra.mxu2 %vm822_vm1, %v626_v21  ;;  %v68_v21 = vld [vmem:[%s3393_s0 + $0x190] sm:$0xff]  ;;  %v585_v23 = vmul.f32 0.01, %v201_v20  ;;  %vm393_vm12 = vcmp.ge.f32.partialorder %v201_v20, 0.0  ;;  %v442_v25 = vmul.f32 0.01, %v58_v7 }
  0x5e   :  { %v452_v12 = vmul.f32 0.01, %v68_v21  ;;  %vm250_vm13 = vcmp.ge.f32.partialorder %v58_v7, 0.0  ;;  %vm260_vm14 = vcmp.ge.f32.partialorder %v68_v21, 0.0  ;;  %v633_v26 = vsel %vm249_vm11, %v57_v18, %v441_v8 }
  0x5f   :  { %v777_v28 = vsel %vm393_vm12, %v201_v20, %v585_v23  ;;  %v634_v11 = vsel %vm250_vm13, %v58_v7, %v442_v25  ;;  %vm269_vm11 = vcmp.ge.f32.partialorder %v77_v58, 0.0  ;;  %vm261_vm12 = vcmp.ge.f32.partialorder %v69_v9, 0.0 }
  0x60   :  { %v644_v16 = vsel %vm260_vm14, %v68_v21, %v452_v12  ;;  %v653_v46 = vsel %vm269_vm11, %v77_v58, %v461_v62  ;;  %vm358_vm13 = vcmp.ge.f32.partialorder %v166_v10, 0.0  ;;  %v464_v18 = vmul.f32 0.01, %v80_v52 }
  0x61   :  { %vm262_vm14 = vcmp.ge.f32.partialorder %v70_v1, 0.0 }
  0x63   :  { %1055 = vmatmul.f32.gmra.mxu0 %v618_v29  ;;  %v60_v29 = vld [vmem:[%s3393_s0 + $0x150] sm:$0xff] }
  0x64   :  { %1199 = vmatmul.f32.gmra.mxu3 %v762_v31  ;;  %1264 = vmatmul.f32.gmra.mxu1 %v619_v32  ;;  %v204_v31 = vld [vmem:[%s3393_s0 + $0x5d0] sm:$0xff]  ;;  %v61_v32 = vld [vmem:[%s3393_s0 + $0x158] sm:$0xff]  ;;  %v444_v19 = vmul.f32 0.01, %v60_v29  ;;  %vm252_vm15 = vcmp.ge.f32.partialorder %v60_v29, 0.0 }
  0x65   :  { %2063 = vmatmul.msk.f32.gmra.mxu2 %vm822_vm1, %v629_v34  ;;  %v71_v34 = vld [vmem:[%s3393_s0 + $0x1a8] sm:$0xff]  ;;  %v588_v36 = vmul.f32 0.01, %v204_v31  ;;  %vm396_vm0 = vcmp.ge.f32.partialorder %v204_v31, 0.0  ;;  %v445_v37 = vmul.f32 0.01, %v61_v32 }
  0x66   :  { %v455_v39 = vmul.f32 0.01, %v71_v34  ;;  %vm253_vm2 = vcmp.ge.f32.partialorder %v61_v32, 0.0  ;;  %vm263_vm3 = vcmp.ge.f32.partialorder %v71_v34, 0.0  ;;  %v636_v41 = vsel %vm252_vm15, %v60_v29, %v444_v19  ;;  %v73_v29 = vld [vmem:[%s3393_s0 + $0x1b8] sm:$0xff]  ;;  %v83_v19 = vld [vmem:[%s3393_s0 + $0x208] sm:$0xff] }
  0x67   :  { %v780_v22 = vsel %vm396_vm0, %v204_v31, %v588_v36  ;;  %v637_v24 = vsel %vm253_vm2, %v61_v32, %v445_v37  ;;  %vm272_vm15 = vcmp.ge.f32.partialorder %v80_v52, 0.0  ;;  %v169_v31 = vld [vmem:[%s3393_s0 + $0x4b8] sm:$0xff] }
  0x6b   :  { %1058 = vmatmul.f32.gmra.mxu0 %v621_v42  ;;  %v647_v42 = vsel %vm263_vm3, %v71_v34, %v455_v39  ;;  %vm361_vm3 = vcmp.ge.f32.partialorder %v169_v31, 0.0 }
  0x6c   :  { %1202 = vmatmul.f32.gmra.mxu3 %v765_v43  ;;  %1267 = vmatmul.f32.gmra.mxu1 %v622_v45  ;;  %v63_v43 = vld [vmem:[%s3393_s0 + $0x168] sm:$0xff] }
  0x6d   :  { %2064 = vmatmul.msk.f32.gmra.mxu2 %vm822_vm1, %v632_v47  ;;  %v207_v45 = vld [vmem:[%s3393_s0 + $0x5e8] sm:$0xff]  ;;  %v64_v47 = vld [vmem:[%s3393_s0 + $0x170] sm:$0xff]  ;;  %v447_v48 = vmul.f32 0.01, %v63_v43  ;;  %vm255_vm4 = vcmp.ge.f32.partialorder %v63_v43, 0.0 }
  0x6e   :  { %v591_v49 = vmul.f32 0.01, %v207_v45  ;;  %vm399_vm5 = vcmp.ge.f32.partialorder %v207_v45, 0.0  ;;  %v448_v50 = vmul.f32 0.01, %v64_v47  ;;  %vm256_vm6 = vcmp.ge.f32.partialorder %v64_v47, 0.0 }
  0x6f   :  { %v639_v30 = vsel %vm255_vm4, %v63_v43, %v447_v48  ;;  %vm265_vm4 = vcmp.ge.f32.partialorder %v73_v29, 0.0 }
  0x70   :  { %v783_v33 = vsel %vm399_vm5, %v207_v45, %v591_v49  ;;  %vm275_vm5 = vcmp.ge.f32.partialorder %v83_v19, 0.0  ;;  %v75_v49 = vld [vmem:[%s3393_s0 + $0x1c8] sm:$0xff] }
  0x73   :  { %1061 = vmatmul.f32.gmra.mxu0 %v624_v54  ;;  %v640_v54 = vsel %vm256_vm6, %v64_v47, %v448_v50 }
  0x74   :  { %1205 = vmatmul.f32.gmra.mxu3 %v768_v55  ;;  %1270 = vmatmul.f32.gmra.mxu1 %v625_v56  ;;  %v650_v55 = vsel %vm266_vm7, %v74_v27, %v458_v51  ;;  %v66_v56 = vld [vmem:[%s3393_s0 + $0x180] sm:$0xff]  ;;  %vm267_vm7 = vcmp.ge.f32.partialorder %v75_v49, 0.0 }
  0x75   :  { %2065 = vmatmul.msk.f32.gmra.mxu2 %vm822_vm1, %v635_v57  ;;  %v163_v57 = vld [vmem:[%s3393_s0 + $0x488] sm:$0xff]  ;;  %v450_v59 = vmul.f32 0.01, %v66_v56  ;;  %vm258_vm8 = vcmp.ge.f32.partialorder %v66_v56, 0.0 }
  0x76   :  { %v547_v60 = vmul.f32 0.01, %v163_v57  ;;  %vm355_vm9 = vcmp.ge.f32.partialorder %v163_v57, 0.0 }
  0x7b   :  { %1064 = vmatmul.f32.gmra.mxu0 %v627_v63  ;;  %v642_v63 = vsel %vm258_vm8, %v66_v56, %v450_v59  ;;  %v86_v56 = vld [vmem:[%s3393_s0 + $0x220] sm:$0xff] }
  0x7c   :  { %1208 = vmatmul.f32.gmra.mxu3 %v771_v0  ;;  %1273 = vmatmul.f32.gmra.mxu1 %v628_v3  ;;  %v739_v0 = vsel %vm355_vm9, %v163_v57, %v547_v60  ;;  %v459_v57 = vmul.f32 0.01, %v75_v49 }
  0x7d   :  { %2066 = vmatmul.msk.f32.gmra.mxu2 %vm822_vm1, %v638_v6  ;;  %v643_v6 = vsel %vm259_vm10, %v67_v35, %v451_v61  ;;  %v470_v61 = vmul.f32 0.01, %v86_v56  ;;  %vm278_vm10 = vcmp.ge.f32.partialorder %v86_v56, 0.0 }
  0x83   :  { %1067 = vmatmul.f32.gmra.mxu0 %v630_v5  ;;  %v2659_v5 = vld [vmem:[%s3396_s3] ss:$0 sm:$0xff] }
  0x84   :  { %1211 = vmatmul.f32.gmra.mxu3 %v774_v4  ;;  %1276 = vmatmul.f32.gmra.mxu1 %v631_v15  ;;  %v453_v4 = vmul.f32 0.01, %v69_v9  ;;  %v550_v15 = vmul.f32 0.01, %v166_v10 }
  0x85   :  { %2067 = vmatmul.msk.f32.gmra.mxu2 %vm822_vm1, %v641_v17  ;;  %v454_v17 = vmul.f32 0.01, %v70_v1 }
  0x86   :  { %v645_v25 = vsel %vm261_vm12, %v69_v9, %v453_v4  ;;  %v742_v12 = vsel %vm358_vm13, %v166_v10, %v550_v15  ;;  %v89_v15 = vld [vmem:[%s3393_s0 + $0x238] sm:$0xff] }
  0x8b   :  { %1070 = vmatmul.f32.gmra.mxu0 %v633_v26  ;;  %v72_v26 = vld [vmem:[%s3393_s0 + $0x1b0] sm:$0xff] }
  0x8c   :  { %1214 = vmatmul.f32.gmra.mxu3 %v777_v28  ;;  %1279 = vmatmul.f32.gmra.mxu1 %v634_v11  ;;  %v646_v11 = vsel %vm262_vm14, %v70_v1, %v454_v17  ;;  %v456_v36 = vmul.f32 0.01, %v72_v26  ;;  %vm264_vm2 = vcmp.ge.f32.partialorder %v72_v26, 0.0  ;;  %v79_v1 = vld [vmem:[%s3393_s0 + $0x1e8] sm:$0xff] }
  0x8d   :  { %2068 = vmatmul.msk.f32.gmra.mxu2 %vm822_vm1, %v644_v16  ;;  %v656_v16 = vsel %vm272_vm15, %v80_v52, %v464_v18  ;;  %v175_v52 = vld [vmem:[%s3393_s0 + $0x4e8] sm:$0xff]  ;;  %vm271_vm14 = vcmp.ge.f32.partialorder %v79_v1, 0.0  ;;  %vm281_vm15 = vcmp.ge.f32.partialorder %v89_v15, 0.0 }
  0x8e   :  { %v1450_v40 = vpop.f32.mrf.mxu2  ;;  %v648_v27 = vsel %vm264_vm2, %v72_v26, %v456_v36  ;;  %vm367_vm13 = vcmp.ge.f32.partialorder %v175_v52, 0.0  ;;  %v82_v36 = vld [vmem:[%s3393_s0 + $0x200] sm:$0xff] }
  0x93   :  { %1073 = vmatmul.f32.gmra.mxu0 %v636_v41  ;;  %v553_v41 = vmul.f32 0.01, %v169_v31 }
  0x94   :  { %1217 = vmatmul.f32.gmra.mxu3 %v780_v22  ;;  %1282 = vmatmul.f32.gmra.mxu1 %v637_v24  ;;  %v467_v22 = vmul.f32 0.01, %v83_v19 }
  0x95   :  { %2069 = vmatmul.msk.f32.gmra.mxu2 %vm822_vm1, %v647_v42  ;;  %v745_v48 = vsel %vm361_vm3, %v169_v31, %v553_v41  ;;  %v81_v31 = vld [vmem:[%s3393_s0 + $0x1f8] sm:$0xff]  ;;  %v92_v41 = vld [vmem:[%s3393_s0 + $0x250] sm:$0xff] }
  0x96   :  { %v2622_v53 = vpop.f32.mrf.mxu2  ;;  %vm273_vm2 = vcmp.ge.f32.partialorder %v81_v31, 0.0 }
  0x9b   :  { %1076 = vmatmul.f32.gmra.mxu0 %v639_v30  ;;  %v76_v30 = vld [vmem:[%s3393_s0 + $0x1d0] sm:$0xff] }
  0x9c   :  { %1220 = vmatmul.f32.gmra.mxu3 %v783_v33  ;;  %1285 = vmatmul.f32.gmra.mxu1 %v640_v54  ;;  %v172_v33 = vld [vmem:[%s3393_s0 + $0x4d0] sm:$0xff]  ;;  %v460_v59 = vmul.f32 0.01, %v76_v30  ;;  %vm268_vm9 = vcmp.ge.f32.partialorder %v76_v30, 0.0 }
  0x9d   :  { %2070 = vmatmul.msk.f32.gmra.mxu2 %vm822_vm1, %v650_v55  ;;  %v556_v60 = vmul.f32 0.01, %v172_v33  ;;  %vm364_vm8 = vcmp.ge.f32.partialorder %v172_v33, 0.0 }
  0x9e   :  { %v2637_v38 = vpop.f32.mrf.mxu2  ;;  %v652_v10 = vsel %vm268_vm9, %v76_v30, %v460_v59 }
  0xa0   :  { %v1032_v44 = vpop.f32.mrf.mxu0 }
  0xa1   :  { %v1241_v3 = vpop.f32.mrf.mxu1 }
  0xa2   :  { %v1242_v13 = vadd.f32 %v1241_v3, %v1032_v44  ;;  %v651_v3 = vsel %vm267_vm7, %v75_v49, %v459_v57 }
  0xa3   :  { %1079 = vmatmul.f32.gmra.mxu0 %v642_v63 }
  0xa4   :  { %1384 = vmatmul.f32.vlgmr.msrb.gmra.mxu3 %v739_v0  ;;  %v1451_v2 = vadd.f32 %v1450_v40, %v1242_v13  ;;  %1288 = vmatmul.f32.gmra.mxu1 %v643_v6  ;;  %v457_v40 = vmul.f32 0.01, %v73_v29  ;;  %v748_v6 = vsel %vm364_vm8, %v172_v33, %v556_v60  ;;  %v662_v13 = vsel %vm278_vm10, %v86_v56, %v470_v61  ;;  %v95_v61 = vld [vmem:[%s3393_s0 + $0x268] sm:$0xff] }
  0xa5   :  { %2071 = vmatmul.msk.f32.gmra.mxu2 %vm822_vm1, %v653_v46  ;;  %v78_v46 = vld [vmem:[%s3393_s0 + $0x1e0] sm:$0xff]  ;;  %vm287_vm10 = vcmp.ge.f32.partialorder %v95_v61, 0.0 }
  0xa6   :  { %v1646_v20 = vmul.f32 %v2648_v14, %v1451_v2  ;;  %v2663_v7 = vpop.f32.mrf.mxu3  ;;  %v649_v51 = vsel %vm265_vm4, %v73_v29, %v457_v40  ;;  %v462_v17 = vmul.f32 0.01, %v78_v46  ;;  %vm270_vm12 = vcmp.ge.f32.partialorder %v78_v46, 0.0 }
  0xa7   :  { %v2665_v21 = vpop.f32.mrf.mxu2  ;;  %vm274_vm4 = vcmp.ge.f32.partialorder %v82_v36, 0.0 }
  0xa8   :  { %v1714_v8 = vadd.f32 %v2659_v5, %v1646_v20  ;;  %v1035_v23 = vpop.f32.mrf.mxu0 }
  0xa9   :  { %v1244_v28 = vpop.f32.mrf.mxu1 }
  0xaa   :  { %vm1778_vm0 = vcmp.ge.f32.partialorder %v1714_v8, 0.0  ;;  %v1842_v32 = vmul.f32 0.01, %v1714_v8  ;;  %v1245_v34 = vadd.f32 %v1244_v28, %v1035_v23  ;;  %v559_v23 = vmul.f32 0.01, %v175_v52 }
  0xab   :  { %1082 = vmatmul.f32.gmra.mxu0 %v645_v25  ;;  %v473_v25 = vmul.f32 0.01, %v89_v15 }
  0xac   :  { %1387 = vmatmul.f32.gmra.mxu3 %v742_v12  ;;  %v1906_v37 = vsel %vm1778_vm0, %v1714_v8, %v1842_v32  ;;  %v1454_v39 = vadd.f32 %v2622_v53, %v1245_v34  ;;  %1291 = vmatmul.f32.gmra.mxu1 %v646_v11  ;;  %v659_v53 = vsel %vm275_vm5, %v83_v19, %v467_v22  ;;  %v463_v8 = vmul.f32 0.01, %v79_v1 }
  0xad   :  { %2072 = vmatmul.msk.f32.gmra.mxu2 %vm822_vm1, %v656_v16  ;;  %1970 = vst [vmem:[#allocation2] sm:$0xff] %v1906_v37  ;;  %v654_v16 = vsel %vm270_vm12, %v78_v46, %v462_v17  ;;  %v751_v29 = vsel %vm367_vm13, %v175_v52, %v559_v23  ;;  %v665_v19 = vsel %vm281_vm15, %v89_v15, %v473_v25  ;;  %v178_v37 = vld [vmem:[%s3393_s0 + $0x500] sm:$0xff]  ;;  %v465_v22 = vmul.f32 0.01, %v81_v31 }
  0xae   :  { %v1647_v24 = vmul.f32 %v2648_v14, %v1454_v39  ;;  %v2683_v42 = vpop.f32.mrf.mxu3  ;;  %v655_v34 = vsel %vm271_vm14, %v79_v1, %v463_v8  ;;  %vm370_vm3 = vcmp.ge.f32.partialorder %v178_v37, 0.0  ;;  %vm284_vm5 = vcmp.ge.f32.partialorder %v92_v41, 0.0  ;;  %v184_v8 = vld [vmem:[%s3393_s0 + $0x530] sm:$0xff] }
  0xaf   :  { %v2685_v43 = vpop.f32.mrf.mxu2  ;;  %v657_v30 = vsel %vm273_vm2, %v81_v31, %v465_v22  ;;  %v479_v46 = vmul.f32 0.01, %v95_v61  ;;  %v568_v31 = vmul.f32 0.01, %v184_v8  ;;  %vm376_vm13 = vcmp.ge.f32.partialorder %v184_v8, 0.0 }
  0xb0   :  { %v1715_v45 = vadd.f32 %v2659_v5, %v1647_v24  ;;  %v1038_v47 = vpop.f32.mrf.mxu0 }
  0xb1   :  { %v1247_v50 = vpop.f32.mrf.mxu1 }
  0xb2   :  { %vm1779_vm6 = vcmp.ge.f32.partialorder %v1715_v45, 0.0  ;;  %v1843_v54 = vmul.f32 0.01, %v1715_v45  ;;  %v1248_v55 = vadd.f32 %v1247_v50, %v1038_v47  ;;  %v466_v47 = vmul.f32 0.01, %v82_v36 }
  0xb3   :  { %1085 = vmatmul.f32.gmra.mxu0 %v648_v27  ;;  %v562_v27 = vmul.f32 0.01, %v178_v37 }
  0xb4   :  { %1390 = vmatmul.f32.gmra.mxu3 %v745_v48  ;;  %v1907_v35 = vsel %vm1779_vm6, %v1715_v45, %v1843_v54  ;;  %v1457_v58 = vadd.f32 %v2637_v38, %v1248_v55  ;;  %1294 = vmatmul.f32.gmra.mxu1 %v649_v51  ;;  %v476_v48 = vmul.f32 0.01, %v92_v41  ;;  %v84_v54 = vld [vmem:[%s3393_s0 + $0x210] sm:$0xff]  ;;  %v658_v56 = vsel %vm274_vm4, %v82_v36, %v466_v47  ;;  %v91_v47 = vld [vmem:[%s3393_s0 + $0x248] sm:$0xff] }
  0xb5   :  { %2073 = vmatmul.msk.f32.gmra.mxu2 %vm822_vm1, %v659_v53  ;;  %1971 = vst [vmem:[#allocation2 + $0x8] sm:$0xff] %v1907_v35  ;;  %v754_v33 = vsel %vm370_vm3, %v178_v37, %v562_v27  ;;  %v85_v35 = vld [vmem:[%s3393_s0 + $0x218] sm:$0xff]  ;;  %vm276_vm7 = vcmp.ge.f32.partialorder %v84_v54, 0.0  ;;  %v187_v27 = vld [vmem:[%s3393_s0 + $0x548] sm:$0xff]  ;;  %vm283_vm4 = vcmp.ge.f32.partialorder %v91_v47, 0.0 }
  0xb6   :  { %v1648_v62 = vmul.f32 %v2648_v14, %v1457_v58  ;;  %v2703_v44 = vpop.f32.mrf.mxu3  ;;  %v668_v57 = vsel %vm284_vm5, %v92_v41, %v476_v48  ;;  %v181_v58 = vld [vmem:[%s3393_s0 + $0x518] sm:$0xff]  ;;  %vm277_vm9 = vcmp.ge.f32.partialorder %v85_v35, 0.0  ;;  %v90_v41 = vld [vmem:[%s3393_s0 + $0x240] sm:$0xff]  ;;  %vm379_vm3 = vcmp.ge.f32.partialorder %v187_v27, 0.0 }
  0xb7   :  { %v2705_v63 = vpop.f32.mrf.mxu2  ;;  %vm373_vm8 = vcmp.ge.f32.partialorder %v181_v58, 0.0  ;;  %vm282_vm2 = vcmp.ge.f32.partialorder %v90_v41, 0.0 }
  0xb8   :  { %v1716_v0 = vadd.f32 %v2659_v5, %v1648_v62  ;;  %v1041_v38 = vpop.f32.mrf.mxu0  ;;  %v468_v62 = vmul.f32 0.01, %v84_v54 }
  0xb9   :  { %v1250_v9 = vpop.f32.mrf.mxu1 }
  0xba   :  { %vm1780_vm11 = vcmp.ge.f32.partialorder %v1716_v0, 0.0  ;;  %v1844_v2 = vmul.f32 0.01, %v1716_v0  ;;  %v1251_v4 = vadd.f32 %v1250_v9, %v1041_v38  ;;  %v660_v52 = vsel %vm276_vm7, %v84_v54, %v468_v62  ;;  %v93_v62 = vld [vmem:[%s3393_s0 + $0x258] sm:$0xff] }
  0xbb   :  { %1088 = vmatmul.f32.gmra.mxu0 %v651_v3  ;;  %v469_v3 = vmul.f32 0.01, %v85_v35  ;;  %v475_v54 = vmul.f32 0.01, %v91_v47  ;;  %vm285_vm7 = vcmp.ge.f32.partialorder %v93_v62, 0.0 }
  0xbc   :  { %1393 = vmatmul.f32.gmra.mxu3 %v748_v6  ;;  %v1908_v18 = vsel %vm1780_vm11, %v1716_v0, %v1844_v2  ;;  %v1460_v20 = vadd.f32 %v2665_v21, %v1251_v4  ;;  %1297 = vmatmul.f32.gmra.mxu1 %v652_v10  ;;  %v565_v6 = vmul.f32 0.01, %v181_v58  ;;  %v87_v4 = vld [vmem:[%s3393_s0 + $0x228] sm:$0xff] }
  0xbd   :  { %2074 = vmatmul.msk.f32.gmra.mxu2 %vm822_vm1, %v662_v13  ;;  %1972 = vst [vmem:[#allocation2 + $0x10] sm:$0xff] %v1908_v18  ;;  %v661_v17 = vsel %vm277_vm9, %v85_v35, %v469_v3  ;;  %v671_v18 = vsel %vm287_vm10, %v95_v61, %v479_v46  ;;  %vm279_vm12 = vcmp.ge.f32.partialorder %v87_v4, 0.0  ;;  %v190_v46 = vld [vmem:[%s3393_s0 + $0x560] sm:$0xff] }
  0xbe   :  { %v1649_v12 = vmul.f32 %v2648_v14, %v1460_v20  ;;  %v2723_v26 = vpop.f32.mrf.mxu3  ;;  %v757_v2 = vsel %vm373_vm8, %v181_v58, %v565_v6  ;;  %v88_v20 = vld [vmem:[%s3393_s0 + $0x230] sm:$0xff]  ;;  %v94_v6 = vld [vmem:[%s3393_s0 + $0x260] sm:$0xff]  ;;  %vm382_vm8 = vcmp.ge.f32.partialorder %v190_v46, 0.0 }
  0xbf   :  { %v2725_v28 = vpop.f32.mrf.mxu2  ;;  %vm280_vm14 = vcmp.ge.f32.partialorder %v88_v20, 0.0  ;;  %vm286_vm9 = vcmp.ge.f32.partialorder %v94_v6, 0.0 }
  0xc0   :  { %v1717_v11 = vadd.f32 %v2659_v5, %v1649_v12  ;;  %v1044_v21 = vpop.f32.mrf.mxu0  ;;  %v98_v12 = vld [vmem:[%s3393_s0 + $0x280] sm:$0xff] }
  0xc1   :  { %v1253_v32 = vpop.f32.mrf.mxu1  ;;  %vm290_vm15 = vcmp.ge.f32.partialorder %v98_v12, 0.0 }
  0xc2   :  { %vm1781_vm0 = vcmp.ge.f32.partialorder %v1717_v11, 0.0  ;;  %v1845_v39 = vmul.f32 0.01, %v1717_v11  ;;  %v1254_v40 = vadd.f32 %v1253_v32, %v1044_v21  ;;  %v482_v32 = vmul.f32 0.01, %v98_v12 }
  0xc3   :  { %1091 = vmatmul.f32.gmra.mxu0 %v654_v16 }
  0xc4   :  { %1396 = vmatmul.f32.gmra.mxu3 %v751_v29  ;;  %v1909_v24 = vsel %vm1781_vm0, %v1717_v11, %v1845_v39  ;;  %v1463_v45 = vadd.f32 %v2685_v43, %v1254_v40  ;;  %1300 = vmatmul.f32.gmra.mxu1 %v655_v34  ;;  %v471_v11 = vmul.f32 0.01, %v87_v4  ;;  %v472_v29 = vmul.f32 0.01, %v88_v20 }
  0xc5   :  { %2075 = vmatmul.msk.f32.gmra.mxu2 %vm822_vm1, %v665_v19  ;;  %1973 = vst [vmem:[#allocation2 + $0x18] sm:$0xff] %v1909_v24  ;;  %v760_v40 = vsel %vm376_vm13, %v184_v8, %v568_v31 }
  0xc6   :  { %v1650_v49 = vmul.f32 %v2648_v14, %v1463_v45  ;;  %v2743_v50 = vpop.f32.mrf.mxu3  ;;  %v663_v39 = vsel %vm279_vm12, %v87_v4, %v471_v11  ;;  %v664_v24 = vsel %vm280_vm14, %v88_v20, %v472_v29  ;;  %v674_v45 = vsel %vm290_vm15, %v98_v12, %v482_v32  ;;  %v97_v32 = vld [vmem:[%s3393_s0 + $0x278] sm:$0xff] }
  0xc7   :  { %v2745_v51 = vpop.f32.mrf.mxu2  ;;  %vm289_vm14 = vcmp.ge.f32.partialorder %v97_v32, 0.0 }
  0xc8   :  { %v1718_v53 = vadd.f32 %v2659_v5, %v1650_v49  ;;  %v1047_v43 = vpop.f32.mrf.mxu0 }
  0xc9   :  { %v1256_v55 = vpop.f32.mrf.mxu1 }
  0xca   :  { %vm1782_vm6 = vcmp.ge.f32.partialorder %v1718_v53, 0.0  ;;  %v1846_v59 = vmul.f32 0.01, %v1718_v53  ;;  %v1257_v60 = vadd.f32 %v1256_v55, %v1047_v43  ;;  %v474_v43 = vmul.f32 0.01, %v90_v41 }
  0xcb   :  { %1094 = vmatmul.f32.gmra.mxu0 %v657_v30  ;;  %v571_v55 = vmul.f32 0.01, %v187_v27 }
  0xcc   :  { %1399 = vmatmul.f32.gmra.mxu3 %v754_v33  ;;  %v1910_v0 = vsel %vm1782_vm6, %v1718_v53, %v1846_v59  ;;  %v1466_v38 = vadd.f32 %v2705_v63, %v1257_v60  ;;  %1303 = vmatmul.f32.gmra.mxu1 %v658_v56  ;;  %v101_v53 = vld [vmem:[%s3393_s0 + $0x298] sm:$0xff]  ;;  %v666_v60 = vsel %vm282_vm2, %v90_v41, %v474_v43 }
  0xcd   :  { %2076 = vmatmul.msk.f32.gmra.mxu2 %vm822_vm1, %v668_v57  ;;  %1974 = vst [vmem:[#allocation2 + $0x20] sm:$0xff] %v1910_v0  ;;  %v485_v56 = vmul.f32 0.01, %v101_v53  ;;  %vm293_vm5 = vcmp.ge.f32.partialorder %v101_v53, 0.0  ;;  %v763_v61 = vsel %vm379_vm3, %v187_v27, %v571_v55 }
  0xce   :  { %v1651_v9 = vmul.f32 %v2648_v14, %v1466_v38  ;;  %v2763_v10 = vpop.f32.mrf.mxu3  ;;  %v667_v38 = vsel %vm283_vm4, %v91_v47, %v475_v54 }
  0xcf   :  { %v2765_v13 = vpop.f32.mrf.mxu2  ;;  %v677_v3 = vsel %vm293_vm5, %v101_v53, %v485_v56 }
  0xd0   :  { %v1719_v1 = vadd.f32 %v2659_v5, %v1651_v9  ;;  %v1050_v63 = vpop.f32.mrf.mxu0 }
  0xd1   :  { %v1259_v15 = vpop.f32.mrf.mxu1 }
  0xd2   :  { %vm1783_vm11 = vcmp.ge.f32.partialorder %v1719_v1, 0.0  ;;  %v1847_v23 = vmul.f32 0.01, %v1719_v1  ;;  %v1260_v25 = vadd.f32 %v1259_v15, %v1050_v63  ;;  %v104_v63 = vld [vmem:[%s3393_s0 + $0x2b0] sm:$0xff]  ;;  %v478_v15 = vmul.f32 0.01, %v94_v6 }
  0xd3   :  { %1097 = vmatmul.f32.gmra.mxu0 %v660_v52  ;;  %v477_v52 = vmul.f32 0.01, %v93_v62  ;;  %vm296_vm10 = vcmp.ge.f32.partialorder %v104_v63, 0.0 }
  0xd4   :  { %1402 = vmatmul.f32.gmra.mxu3 %v757_v2  ;;  %v1911_v21 = vsel %vm1783_vm11, %v1719_v1, %v1847_v23  ;;  %v1469_v16 = vadd.f32 %v2725_v28, %v1260_v25  ;;  %1306 = vmatmul.f32.gmra.mxu1 %v661_v17  ;;  %v574_v17 = vmul.f32 0.01, %v190_v46  ;;  %v670_v29 = vsel %vm286_vm9, %v94_v6, %v478_v15  ;;  %v102_v15 = vld [vmem:[%s3393_s0 + $0x2a0] sm:$0xff] }
  0xd5   :  { %2077 = vmatmul.msk.f32.gmra.mxu2 %vm822_vm1, %v671_v18  ;;  %1975 = vst [vmem:[#allocation2 + $0x28] sm:$0xff] %v1911_v21  ;;  %v488_v18 = vmul.f32 0.01, %v104_v63  ;;  %v669_v12 = vsel %vm285_vm7, %v93_v62, %v477_v52  ;;  %v96_v21 = vld [vmem:[%s3393_s0 + $0x270] sm:$0xff]  ;;  %vm294_vm7 = vcmp.ge.f32.partialorder %v102_v15, 0.0 }
  0xd6   :  { %v1652_v34 = vmul.f32 %v2648_v14, %v1469_v16  ;;  %v766_v11 = vsel %vm382_vm8, %v190_v46, %v574_v17  ;;  %vm288_vm12 = vcmp.ge.f32.partialorder %v96_v21, 0.0 }
  0xd7   :  { %v2783_v19 = vpop.f32.mrf.mxu3  ;;  %v680_v31 = vsel %vm296_vm10, %v104_v63, %v488_v18 }
  0xd8   :  { %v2785_v36 = vpop.f32.mrf.mxu2  ;;  %v1720_v37 = vadd.f32 %v2659_v5, %v1652_v34  ;;  %v1053_v28 = vpop.f32.mrf.mxu0  ;;  %v193_v34 = vld [vmem:[%s3393_s0 + $0x578] sm:$0xff] }
  0xd9   :  { %v1262_v22 = vpop.f32.mrf.mxu1  ;;  %vm385_vm13 = vcmp.ge.f32.partialorder %v193_v34, 0.0 }
  0xda   :  { %vm1784_vm0 = vcmp.ge.f32.partialorder %v1720_v37, 0.0  ;;  %v1848_v48 = vmul.f32 0.01, %v1720_v37  ;;  %v1263_v49 = vadd.f32 %v1262_v22, %v1053_v28 }
  0xdb   :  { %1100 = vmatmul.f32.gmra.mxu0 %v663_v39  ;;  %v107_v39 = vld [vmem:[%s3393_s0 + $0x2c8] sm:$0xff] }
  0xdc   :  { %1405 = vmatmul.f32.gmra.mxu3 %v760_v40  ;;  %v1912_v30 = vsel %vm1784_vm0, %v1720_v37, %v1848_v48  ;;  %v1472_v33 = vadd.f32 %v2745_v51, %v1263_v49  ;;  %1309 = vmatmul.f32.gmra.mxu1 %v664_v24  ;;  %v480_v40 = vmul.f32 0.01, %v96_v21  ;;  %v481_v24 = vmul.f32 0.01, %v97_v32 }
  0xdd   :  { %2078 = vmatmul.msk.f32.gmra.mxu2 %vm822_vm1, %v674_v45  ;;  %1976 = vst [vmem:[#allocation2 + $0x30] sm:$0xff] %v1912_v30  ;;  %v577_v45 = vmul.f32 0.01, %v193_v34  ;;  %v491_v47 = vmul.f32 0.01, %v107_v39  ;;  %vm299_vm15 = vcmp.ge.f32.partialorder %v107_v39, 0.0 }
  0xde   :  { %v1653_v57 = vmul.f32 %v2648_v14, %v1472_v33  ;;  %v672_v43 = vsel %vm288_vm12, %v96_v21, %v480_v40  ;;  %v99_v33 = vld [vmem:[%s3393_s0 + $0x288] sm:$0xff]  ;;  %v673_v55 = vsel %vm289_vm14, %v97_v32, %v481_v24  ;;  %v113_v21 = vld [vmem:[%s3393_s0 + $0x2f8] sm:$0xff] }
  0xdf   :  { %v2803_v35 = vpop.f32.mrf.mxu3  ;;  %v769_v30 = vsel %vm385_vm13, %v193_v34, %v577_v45  ;;  %v683_v56 = vsel %vm299_vm15, %v107_v39, %v491_v47  ;;  %v483_v62 = vmul.f32 0.01, %v99_v33  ;;  %vm291_vm2 = vcmp.ge.f32.partialorder %v99_v33, 0.0  ;;  %v105_v45 = vld [vmem:[%s3393_s0 + $0x2b8] sm:$0xff] }
  0xe0   :  { %v2805_v58 = vpop.f32.mrf.mxu2  ;;  %v1721_v59 = vadd.f32 %v2659_v5, %v1653_v57  ;;  %v1056_v51 = vpop.f32.mrf.mxu0  ;;  %v100_v57 = vld [vmem:[%s3393_s0 + $0x290] sm:$0xff]  ;;  %vm305_vm10 = vcmp.ge.f32.partialorder %v113_v21, 0.0  ;;  %vm297_vm12 = vcmp.ge.f32.partialorder %v105_v45, 0.0 }
  0xe1   :  { %v1265_v0 = vpop.f32.mrf.mxu1  ;;  %vm292_vm4 = vcmp.ge.f32.partialorder %v100_v57, 0.0 }
  0xe2   :  { %vm1785_vm6 = vcmp.ge.f32.partialorder %v1721_v59, 0.0  ;;  %v1849_v9 = vmul.f32 0.01, %v1721_v59  ;;  %v1266_v1 = vadd.f32 %v1265_v0, %v1056_v51 }
  0xe3   :  { %1103 = vmatmul.f32.gmra.mxu0 %v666_v60 }
  0xe4   :  { %1408 = vmatmul.f32.gmra.mxu3 %v763_v61  ;;  %v1913_v2 = vsel %vm1785_vm6, %v1721_v59, %v1849_v9  ;;  %v1475_v4 = vadd.f32 %v2765_v13, %v1266_v1  ;;  %1312 = vmatmul.f32.gmra.mxu1 %v667_v38  ;;  %v196_v59 = vld [vmem:[%s3393_s0 + $0x590] sm:$0xff]  ;;  %v110_v61 = vld [vmem:[%s3393_s0 + $0x2e0] sm:$0xff] }
  0xe5   :  { %2079 = vmatmul.msk.f32.gmra.mxu2 %vm822_vm1, %v677_v3  ;;  %1977 = vst [vmem:[#allocation2 + $0x38] sm:$0xff] %v1913_v2  ;;  %v484_v3 = vmul.f32 0.01, %v100_v57  ;;  %v580_v6 = vmul.f32 0.01, %v196_v59  ;;  %vm388_vm3 = vcmp.ge.f32.partialorder %v196_v59, 0.0  ;;  %v675_v2 = vsel %vm291_vm2, %v99_v33, %v483_v62 }
  0xe6   :  { %v1654_v20 = vmul.f32 %v2648_v14, %v1475_v4  ;;  %v494_v46 = vmul.f32 0.01, %v110_v61  ;;  %vm302_vm5 = vcmp.ge.f32.partialorder %v110_v61, 0.0 }
  0xe7   :  { %v2823_v8 = vpop.f32.mrf.mxu3  ;;  %v772_v4 = vsel %vm388_vm3, %v196_v59, %v580_v6  ;;  %v676_v18 = vsel %vm292_vm4, %v100_v57, %v484_v3 }
  0xe8   :  { %v2825_v23 = vpop.f32.mrf.mxu2  ;;  %v1722_v25 = vadd.f32 %v2659_v5, %v1654_v20  ;;  %v1059_v13 = vpop.f32.mrf.mxu0  ;;  %v686_v20 = vsel %vm302_vm5, %v110_v61, %v494_v46  ;;  %v108_v46 = vld [vmem:[%s3393_s0 + $0x2d0] sm:$0xff] }
  0xe9   :  { %v1268_v16 = vpop.f32.mrf.mxu1  ;;  %vm300_vm2 = vcmp.ge.f32.partialorder %v108_v46, 0.0 }
  0xea   :  { %vm1786_vm11 = vcmp.ge.f32.partialorder %v1722_v25, 0.0  ;;  %v1850_v37 = vmul.f32 0.01, %v1722_v25  ;;  %v1269_v28 = vadd.f32 %v1268_v16, %v1059_v13  ;;  %v199_v13 = vld [vmem:[%s3393_s0 + $0x5a8] sm:$0xff]  ;;  %v486_v16 = vmul.f32 0.01, %v102_v15 }
  0xeb   :  { %1106 = vmatmul.f32.gmra.mxu0 %v669_v12  ;;  %v583_v34 = vmul.f32 0.01, %v199_v13  ;;  %vm391_vm8 = vcmp.ge.f32.partialorder %v199_v13, 0.0 }
  0xec   :  { %1411 = vmatmul.f32.gmra.mxu3 %v766_v11  ;;  %v1914_v41 = vsel %vm1786_vm11, %v1722_v25, %v1850_v37  ;;  %v1478_v22 = vadd.f32 %v2785_v36, %v1269_v28  ;;  %1315 = vmatmul.f32.gmra.mxu1 %v670_v29  ;;  %v103_v25 = vld [vmem:[%s3393_s0 + $0x2a8] sm:$0xff]  ;;  %v497_v37 = vmul.f32 0.01, %v113_v21 }
  0xed   :  { %2080 = vmatmul.msk.f32.gmra.mxu2 %vm822_vm1, %v680_v31  ;;  %1978 = vst [vmem:[#allocation2 + $0x40] sm:$0xff] %v1914_v41  ;;  %v487_v32 = vmul.f32 0.01, %v103_v25  ;;  %vm295_vm9 = vcmp.ge.f32.partialorder %v103_v25, 0.0  ;;  %v775_v24 = vsel %vm391_vm8, %v199_v13, %v583_v34 }
  0xee   :  { %v1655_v27 = vmul.f32 %v2648_v14, %v1478_v22  ;;  %v678_v22 = vsel %vm294_vm7, %v102_v15, %v486_v16 }
  0xef   :  { %v2843_v48 = vpop.f32.mrf.mxu3 }
  0xf0   :  { %v2845_v49 = vpop.f32.mrf.mxu2  ;;  %v1723_v53 = vadd.f32 %v2659_v5, %v1655_v27  ;;  %v1062_v36 = vpop.f32.mrf.mxu0  ;;  %v679_v27 = vsel %vm295_vm9, %v103_v25, %v487_v32 }
  0xf1   :  { %v1271_v54 = vpop.f32.mrf.mxu1 }
  0xf2   :  { %vm1787_vm0 = vcmp.ge.f32.partialorder %v1723_v53, 0.0  ;;  %v1851_v51 = vmul.f32 0.01, %v1723_v53  ;;  %v1272_v60 = vadd.f32 %v1271_v54, %v1062_v36  ;;  %v106_v36 = vld [vmem:[%s3393_s0 + $0x2c0] sm:$0xff]  ;;  %v116_v54 = vld [vmem:[%s3393_s0 + $0x310] sm:$0xff] }
  0xf3   :  { %1109 = vmatmul.f32.gmra.mxu0 %v672_v43  ;;  %v202_v43 = vld [vmem:[%s3393_s0 + $0x5c0] sm:$0xff]  ;;  %v490_v59 = vmul.f32 0.01, %v106_v36  ;;  %vm298_vm14 = vcmp.ge.f32.partialorder %v106_v36, 0.0  ;;  %vm308_vm15 = vcmp.ge.f32.partialorder %v116_v54, 0.0 }
  0xf4   :  { %1414 = vmatmul.f32.gmra.mxu3 %v769_v30  ;;  %v1915_v0 = vsel %vm1787_vm0, %v1723_v53, %v1851_v51  ;;  %v1481_v38 = vadd.f32 %v2805_v58, %v1272_v60  ;;  %1318 = vmatmul.f32.gmra.mxu1 %v673_v55  ;;  %v689_v53 = vsel %vm305_vm10, %v113_v21, %v497_v37  ;;  %v489_v55 = vmul.f32 0.01, %v105_v45 }
  0xf5   :  { %2081 = vmatmul.msk.f32.gmra.mxu2 %vm822_vm1, %v683_v56  ;;  %1979 = vst [vmem:[#allocation2 + $0x48] sm:$0xff] %v1915_v0  ;;  %v586_v51 = vmul.f32 0.01, %v202_v43  ;;  %vm394_vm13 = vcmp.ge.f32.partialorder %v202_v43, 0.0  ;;  %v500_v60 = vmul.f32 0.01, %v116_v54 }
  0xf6   :  { %v1656_v9 = vmul.f32 %v2648_v14, %v1481_v38  ;;  %v681_v3 = vsel %vm297_vm12, %v105_v45, %v489_v55  ;;  %v208_v45 = vld [vmem:[%s3393_s0 + $0x5f0] sm:$0xff] }
  0xf7   :  { %v2863_v1 = vpop.f32.mrf.mxu3  ;;  %v778_v6 = vsel %vm394_vm13, %v202_v43, %v586_v51  ;;  %vm400_vm8 = vcmp.ge.f32.partialorder %v208_v45, 0.0 }
  0xf8   :  { %v2865_v63 = vpop.f32.mrf.mxu2  ;;  %v1724_v52 = vadd.f32 %v2659_v5, %v1656_v9  ;;  %v1065_v58 = vpop.f32.mrf.mxu0 }
  0xf9   :  { %v1274_v17 = vpop.f32.mrf.mxu1 }
  0xfa   :  { %vm1788_vm6 = vcmp.ge.f32.partialorder %v1724_v52, 0.0  ;;  %v1852_v12 = vmul.f32 0.01, %v1724_v52  ;;  %v1275_v11 = vadd.f32 %v1274_v17, %v1065_v58  ;;  %v692_v58 = vsel %vm308_vm15, %v116_v54, %v500_v60 }
  0xfb   :  { %1112 = vmatmul.f32.gmra.mxu0 %v675_v2  ;;  %v109_v2 = vld [vmem:[%s3393_s0 + $0x2d8] sm:$0xff]  ;;  %v592_v54 = vmul.f32 0.01, %v208_v45 }
  0xfc   :  { %1417 = vmatmul.f32.gmra.mxu3 %v772_v4  ;;  %v1916_v29 = vsel %vm1788_vm6, %v1724_v52, %v1852_v12  ;;  %v1484_v31 = vadd.f32 %v2825_v23, %v1275_v11  ;;  %1321 = vmatmul.f32.gmra.mxu1 %v676_v18  ;;  %v682_v52 = vsel %vm298_vm14, %v106_v36, %v490_v59  ;;  %v205_v4 = vld [vmem:[%s3393_s0 + $0x5d8] sm:$0xff]  ;;  %v119_v18 = vld [vmem:[%s3393_s0 + $0x328] sm:$0xff]  ;;  %v493_v12 = vmul.f32 0.01, %v109_v2 }
  0xfd   :  { %2082 = vmatmul.msk.f32.gmra.mxu2 %vm822_vm1, %v686_v20  ;;  %1980 = vst [vmem:[#allocation2 + $0x50] sm:$0xff] %v1916_v29  ;;  %v492_v20 = vmul.f32 0.01, %v108_v46  ;;  %v589_v11 = vmul.f32 0.01, %v205_v4  ;;  %vm397_vm3 = vcmp.ge.f32.partialorder %v205_v4, 0.0 }
  0xfe   :  { %v1657_v28 = vmul.f32 %v2648_v14, %v1484_v31  ;;  %v503_v21 = vmul.f32 0.01, %v119_v18  ;;  %vm301_vm4 = vcmp.ge.f32.partialorder %v109_v2, 0.0  ;;  %vm311_vm5 = vcmp.ge.f32.partialorder %v119_v18, 0.0 }
  0xff   :  { %v2883_v39 = vpop.f32.mrf.mxu3  ;;  %v684_v34 = vsel %vm300_vm2, %v108_v46, %v492_v20  ;;  %v781_v37 = vsel %vm397_vm3, %v205_v4, %v589_v11  ;;  %v115_v46 = vld [vmem:[%s3393_s0 + $0x308] sm:$0xff] }
 0x100   :  { %v2885_v40 = vpop.f32.mrf.mxu2  ;;  %v1725_v41 = vadd.f32 %v2659_v5, %v1657_v28  ;;  %v1068_v23 = vpop.f32.mrf.mxu0  ;;  %v111_v28 = vld [vmem:[%s3393_s0 + $0x2e8] sm:$0xff]  ;;  %vm307_vm14 = vcmp.ge.f32.partialorder %v115_v46, 0.0 }
 0x101   :  { %v1277_v47 = vpop.f32.mrf.mxu1  ;;  %v495_v36 = vmul.f32 0.01, %v111_v28  ;;  %vm303_vm7 = vcmp.ge.f32.partialorder %v111_v28, 0.0 }
 0x102   :  { %vm1789_vm11 = vcmp.ge.f32.partialorder %v1725_v41, 0.0  ;;  %v1853_v30 = vmul.f32 0.01, %v1725_v41  ;;  %v1278_v33 = vadd.f32 %v1277_v47, %v1068_v23  ;;  %v685_v23 = vsel %vm301_vm4, %v109_v2, %v493_v12  ;;  %v125_v2 = vld [vmem:[%s3393_s0 + $0x358] sm:$0xff] }
 0x103   :  { %1115 = vmatmul.f32.gmra.mxu0 %v678_v22  ;;  %v695_v22 = vsel %vm311_vm5, %v119_v18, %v503_v21  ;;  %v687_v60 = vsel %vm303_vm7, %v111_v28, %v495_v36  ;;  %v499_v18 = vmul.f32 0.01, %v115_v46  ;;  %vm317_vm15 = vcmp.ge.f32.partialorder %v125_v2, 0.0 }
 0x104   :  { %1420 = vmatmul.f32.gmra.mxu3 %v775_v24  ;;  %v1917_v56 = vsel %vm1789_vm11, %v1725_v41, %v1853_v30  ;;  %v1487_v57 = vadd.f32 %v2845_v49, %v1278_v33  ;;  %1324 = vmatmul.f32.gmra.mxu1 %v679_v27  ;;  %v112_v24 = vld [vmem:[%s3393_s0 + $0x2f0] sm:$0xff] }
 0x105   :  { %2083 = vmatmul.msk.f32.gmra.mxu2 %vm822_vm1, %v689_v53  ;;  %1981 = vst [vmem:[#allocation2 + $0x58] sm:$0xff] %v1917_v56  ;;  %v122_v53 = vld [vmem:[%s3393_s0 + $0x340] sm:$0xff]  ;;  %v496_v33 = vmul.f32 0.01, %v112_v24  ;;  %vm304_vm9 = vcmp.ge.f32.partialorder %v112_v24, 0.0 }
 0x106   :  { %v1658_v61 = vmul.f32 %v2648_v14, %v1487_v57  ;;  %v506_v55 = vmul.f32 0.01, %v122_v53  ;;  %vm314_vm10 = vcmp.ge.f32.partialorder %v122_v53, 0.0 }
 0x107   :  { %v2903_v62 = vpop.f32.mrf.mxu3 }
 0x108   :  { %v2905_v0 = vpop.f32.mrf.mxu2  ;;  %v1726_v38 = vadd.f32 %v2659_v5, %v1658_v61  ;;  %v1071_v49 = vpop.f32.mrf.mxu0  ;;  %v784_v61 = vsel %vm400_vm8, %v208_v45, %v592_v54  ;;  %v2996_v54 = vld [vmem:[%s3396_s3] ss:$0 sm:$0xff] }
 0x109   :  { %v1280_v9 = vpop.f32.mrf.mxu1 }
 0x10a   :  { %vm1790_vm0 = vcmp.ge.f32.partialorder %v1726_v38, 0.0  ;;  %v1854_v15 = vmul.f32 0.01, %v1726_v38  ;;  %v1281_v17 = vadd.f32 %v1280_v9, %v1071_v49  ;;  %v173_v9 = vld [vmem:[%s3393_s0 + $0x4d8] sm:$0xff] }
 0x10b   :  { %1118 = vmatmul.f32.gmra.mxu0 %v681_v3  ;;  %v688_v3 = vsel %vm304_vm9, %v112_v24, %v496_v33  ;;  %v557_v20 = vmul.f32 0.01, %v173_v9  ;;  %vm365_vm13 = vcmp.ge.f32.partialorder %v173_v9, 0.0 }
 0x10c   :  { %1423 = vmatmul.f32.gmra.mxu3 %v778_v6  ;;  %v1918_v25 = vsel %vm1790_vm0, %v1726_v38, %v1854_v15  ;;  %v1490_v13 = vadd.f32 %v2865_v63, %v1281_v17  ;;  %1327 = vmatmul.f32.gmra.mxu1 %v682_v52  ;;  %v114_v38 = vld [vmem:[%s3393_s0 + $0x300] sm:$0xff]  ;;  %v698_v6 = vsel %vm314_vm10, %v122_v53, %v506_v55 }
 0x10d   :  { %2084 = vmatmul.msk.f32.gmra.mxu2 %vm822_vm1, %v692_v58  ;;  %1982 = vst [vmem:[#allocation2 + $0x60] sm:$0xff] %v1918_v25  ;;  %v498_v4 = vmul.f32 0.01, %v114_v38  ;;  %vm306_vm12 = vcmp.ge.f32.partialorder %v114_v38, 0.0  ;;  %v509_v25 = vmul.f32 0.01, %v125_v2 }
 0x10e   :  { %v1659_v16 = vmul.f32 %v2648_v14, %v1490_v13 }
 0x10f   :  { %v2923_v29 = vpop.f32.mrf.mxu3  ;;  %v701_v28 = vsel %vm317_vm15, %v125_v2, %v509_v25 }
 0x110   :  { %v2925_v31 = vpop.f32.mrf.mxu2  ;;  %v1727_v32 = vadd.f32 %v2659_v5, %v1659_v16  ;;  %v1074_v63 = vpop.f32.mrf.mxu0  ;;  %v690_v16 = vsel %vm306_vm12, %v114_v38, %v498_v4 }
 0x111   :  { %v1283_v41 = vpop.f32.mrf.mxu1 }
 0x112   :  { %vm1791_vm6 = vcmp.ge.f32.partialorder %v1727_v32, 0.0  ;;  %v1855_v47 = vmul.f32 0.01, %v1727_v32  ;;  %v1284_v27 = vadd.f32 %v1283_v41, %v1074_v63  ;;  %v117_v63 = vld [vmem:[%s3393_s0 + $0x318] sm:$0xff]  ;;  %v176_v41 = vld [vmem:[%s3393_s0 + $0x4f0] sm:$0xff] }
 0x113   :  { %1121 = vmatmul.f32.gmra.mxu0 %v684_v34  ;;  %v501_v24 = vmul.f32 0.01, %v117_v63  ;;  %v560_v53 = vmul.f32 0.01, %v176_v41  ;;  %vm309_vm2 = vcmp.ge.f32.partialorder %v117_v63, 0.0  ;;  %vm368_vm3 = vcmp.ge.f32.partialorder %v176_v41, 0.0 }
 0x114   :  { %1426 = vmatmul.f32.gmra.mxu3 %v781_v37  ;;  %v1919_v43 = vsel %vm1791_vm6, %v1727_v32, %v1855_v47  ;;  %v1493_v30 = vadd.f32 %v2885_v40, %v1284_v27  ;;  %1330 = vmatmul.f32.gmra.mxu1 %v685_v23  ;;  %v749_v32 = vsel %vm365_vm13, %v173_v9, %v557_v20 }
 0x115   :  { %2085 = vmatmul.msk.f32.gmra.mxu2 %vm822_vm1, %v695_v22  ;;  %1983 = vst [vmem:[#allocation2 + $0x68] sm:$0xff] %v1919_v43  ;;  %v691_v37 = vsel %vm307_vm14, %v115_v46, %v499_v18  ;;  %v128_v22 = vld [vmem:[%s3393_s0 + $0x370] sm:$0xff]  ;;  %v2986_v43 = vld [vmem:[%s3395_s2] ss:$0 sm:$0xff] }
 0x116   :  { %v1660_v56 = vmul.f32 %v2648_v14, %v1493_v30  ;;  %v512_v36 = vmul.f32 0.01, %v128_v22  ;;  %vm320_vm5 = vcmp.ge.f32.partialorder %v128_v22, 0.0 }
 0x117   :  { %v2943_v57 = vpop.f32.mrf.mxu3 }
 0x118   :  { %v2945_v59 = vpop.f32.mrf.mxu2  ;;  %v1728_v51 = vadd.f32 %v2659_v5, %v1660_v56  ;;  %v1077_v40 = vpop.f32.mrf.mxu0 }
 0x119   :  { %v1286_v49 = vpop.f32.mrf.mxu1 }
 0x11a   :  { %vm1792_vm11 = vcmp.ge.f32.partialorder %v1728_v51, 0.0  ;;  %v1856_v52 = vmul.f32 0.01, %v1728_v51  ;;  %v1287_v58 = vadd.f32 %v1286_v49, %v1077_v40  ;;  %v752_v40 = vsel %vm368_vm3, %v176_v41, %v560_v53 }
 0x11b   :  { %1124 = vmatmul.f32.gmra.mxu0 %v687_v60  ;;  %v120_v60 = vld [vmem:[%s3393_s0 + $0x330] sm:$0xff]  ;;  %v704_v49 = vsel %vm320_vm5, %v128_v22, %v512_v36 }
 0x11c   :  { %1429 = vmatmul.f32.gmra.mxu3 %v784_v61  ;;  %v1920_v15 = vsel %vm1792_vm11, %v1728_v51, %v1856_v52  ;;  %v1496_v17 = vadd.f32 %v2905_v0, %v1287_v58  ;;  %1333 = vmatmul.f32.gmra.mxu1 %v688_v3  ;;  %v693_v51 = vsel %vm309_vm2, %v117_v63, %v501_v24  ;;  %v121_v3 = vld [vmem:[%s3393_s0 + $0x338] sm:$0xff]  ;;  %v131_v52 = vld [vmem:[%s3393_s0 + $0x388] sm:$0xff]  ;;  %v504_v58 = vmul.f32 0.01, %v120_v60 }
 0x11d   :  { %2086 = vmatmul.msk.f32.gmra.mxu2 %vm822_vm1, %v698_v6  ;;  %1984 = vst [vmem:[#allocation2 + $0x70] sm:$0xff] %v1920_v15  ;;  %v179_v6 = vld [vmem:[%s3393_s0 + $0x508] sm:$0xff]  ;;  %v505_v15 = vmul.f32 0.01, %v121_v3  ;;  %vm312_vm7 = vcmp.ge.f32.partialorder %v120_v60, 0.0  ;;  %vm313_vm9 = vcmp.ge.f32.partialorder %v121_v3, 0.0 }
 0x11e   :  { %v1661_v13 = vmul.f32 %v2648_v14, %v1496_v17  ;;  %v118_v14 = vld [vmem:[%s3393_s0 + $0x320] sm:$0xff]  ;;  %v563_v17 = vmul.f32 0.01, %v179_v6  ;;  %v515_v18 = vmul.f32 0.01, %v131_v52  ;;  %vm371_vm8 = vcmp.ge.f32.partialorder %v179_v6, 0.0 }
 0x11f   :  { %v2963_v12 = vpop.f32.mrf.mxu3  ;;  %v502_v27 = vmul.f32 0.01, %v118_v14  ;;  %vm310_vm4 = vcmp.ge.f32.partialorder %v118_v14, 0.0  ;;  %vm323_vm10 = vcmp.ge.f32.partialorder %v131_v52, 0.0 }
 0x120   :  { %v2965_v11 = vpop.f32.mrf.mxu2  ;;  %v1729_v21 = vadd.f32 %v2659_v5, %v1661_v13  ;;  %v1080_v0 = vpop.f32.mrf.mxu0 }
 0x121   :  { %v1289_v34 = vpop.f32.mrf.mxu1  ;;  %v694_v38 = vsel %vm310_vm4, %v118_v14, %v502_v27  ;;  %v182_v14 = vld [vmem:[%s3393_s0 + $0x520] sm:$0xff] }
 0x122   :  { %vm1793_vm0 = vcmp.ge.f32.partialorder %v1729_v21, 0.0  ;;  %v1857_v5 = vmul.f32 0.01, %v1729_v21  ;;  %v1290_v23 = vadd.f32 %v1289_v34, %v1080_v0  ;;  %v696_v0 = vsel %vm312_vm7, %v120_v60, %v504_v58  ;;  %v126_v60 = vld [vmem:[%s3393_s0 + $0x360] sm:$0xff] }
 0x123   :  { %1127 = vmatmul.f32.gmra.mxu0 %v690_v16  ;;  %v755_v16 = vsel %vm371_vm8, %v179_v6, %v563_v17  ;;  %v697_v34 = vsel %vm313_vm9, %v121_v3, %v505_v15  ;;  %v566_v27 = vmul.f32 0.01, %v182_v14  ;;  %vm374_vm13 = vcmp.ge.f32.partialorder %v182_v14, 0.0  ;;  %v127_v3 = vld [vmem:[%s3393_s0 + $0x368] sm:$0xff]  ;;  %v185_v6 = vld [vmem:[%s3393_s0 + $0x538] sm:$0xff] }
 0x124   :  { %2103 = vmatmul.msk.f32.vlgmr.msra.gmra.mxu3 %vm822_vm1, %v749_v32  ;;  %v1921_v45 = vsel %vm1793_vm0, %v1729_v21, %v1857_v5  ;;  %v1499_v47 = vadd.f32 %v2925_v31, %v1290_v23  ;;  %1336 = vmatmul.f32.gmra.mxu1 %v691_v37  ;;  %v123_v32 = vld [vmem:[%s3393_s0 + $0x348] sm:$0xff]  ;;  %v707_v37 = vsel %vm323_vm10, %v131_v52, %v515_v18  ;;  %v134_v23 = vld [vmem:[%s3393_s0 + $0x3a0] sm:$0xff]  ;;  %v137_v52 = vld [vmem:[%s3393_s0 + $0x3b8] sm:$0xff]  ;;  %v510_v58 = vmul.f32 0.01, %v126_v60 }
 0x125   :  { %2087 = vmatmul.msk.f32.gmra.mxu2 %vm822_vm1, %v701_v28  ;;  %1985 = vst [vmem:[#allocation2 + $0x78] sm:$0xff] %v1921_v45  ;;  %v124_v28 = vld [vmem:[%s3393_s0 + $0x350] sm:$0xff]  ;;  %v507_v22 = vmul.f32 0.01, %v123_v32  ;;  %vm315_vm12 = vcmp.ge.f32.partialorder %v123_v32, 0.0  ;;  %vm326_vm15 = vcmp.ge.f32.partialorder %v134_v23, 0.0 }
 0x126   :  { %v1662_v30 = vmul.f32 %v2986_v43, %v1499_v47  ;;  %v508_v47 = vmul.f32 0.01, %v124_v28  ;;  %v518_v53 = vmul.f32 0.01, %v134_v23  ;;  %vm316_vm14 = vcmp.ge.f32.partialorder %v124_v28, 0.0 }
 0x127   :  { %v2989_v33 = vpop.f32.mrf.mxu3  ;;  %v511_v15 = vmul.f32 0.01, %v127_v3  ;;  %v569_v17 = vmul.f32 0.01, %v185_v6  ;;  %vm318_vm2 = vcmp.ge.f32.partialorder %v126_v60, 0.0  ;;  %vm377_vm3 = vcmp.ge.f32.partialorder %v185_v6, 0.0 }
 0x128   :  { %v2991_v31 = vpop.f32.mrf.mxu2  ;;  %v1730_v55 = vadd.f32 %v2996_v54, %v1662_v30  ;;  %v1083_v56 = vpop.f32.mrf.mxu0  ;;  %v521_v18 = vmul.f32 0.01, %v137_v52  ;;  %vm319_vm4 = vcmp.ge.f32.partialorder %v127_v3, 0.0  ;;  %vm329_vm5 = vcmp.ge.f32.partialorder %v137_v52, 0.0 }
 0x129   :  { %v1292_v61 = vpop.f32.mrf.mxu1 }
 0x12a   :  { %vm1794_vm6 = vcmp.ge.f32.partialorder %v1730_v55, 0.0  ;;  %v1858_v46 = vmul.f32 0.01, %v1730_v55  ;;  %v1293_v9 = vadd.f32 %v1292_v61, %v1083_v56 }
 0x12b   :  { %1130 = vmatmul.f32.gmra.mxu0 %v693_v51  ;;  %v699_v51 = vsel %vm315_vm12, %v123_v32, %v507_v22  ;;  %v761_v32 = vsel %vm377_vm3, %v185_v6, %v569_v17  ;;  %v140_v22 = vld [vmem:[%s3393_s0 + $0x3d0] sm:$0xff] }
 0x12c   :  { %2104 = vmatmul.msk.f32.gmra.mxu3 %vm822_vm1, %v752_v40  ;;  %v1922_v2 = vsel %vm1794_vm6, %v1730_v55, %v1858_v46  ;;  %v1502_v4 = vadd.f32 %v2945_v59, %v1293_v9  ;;  %1339 = vmatmul.f32.gmra.mxu1 %v694_v38  ;;  %v758_v40 = vsel %vm374_vm13, %v182_v14, %v566_v27  ;;  %v130_v14 = vld [vmem:[%s3393_s0 + $0x380] sm:$0xff]  ;;  %vm332_vm10 = vcmp.ge.f32.partialorder %v140_v22, 0.0 }
 0x12d   :  { %2088 = vmatmul.msk.f32.gmra.mxu2 %vm822_vm1, %v704_v49  ;;  %1986 = vst [vmem:[#allocation2 + $0x80] sm:$0xff] %v1922_v2  ;;  %v700_v38 = vsel %vm316_vm14, %v124_v28, %v508_v47  ;;  %v710_v49 = vsel %vm326_vm15, %v134_v23, %v518_v53  ;;  %v713_v28 = vsel %vm329_vm5, %v137_v52, %v521_v18  ;;  %v514_v27 = vmul.f32 0.01, %v130_v14 }
 0x12e   :  { %v1663_v20 = vmul.f32 %v2986_v43, %v1502_v4  ;;  %vm322_vm9 = vcmp.ge.f32.partialorder %v130_v14, 0.0 }
 0x12f   :  { %v3015_v25 = vpop.f32.mrf.mxu3 }
 0x130   :  { %v3017_v13 = vpop.f32.mrf.mxu2  ;;  %v1731_v21 = vadd.f32 %v2996_v54, %v1663_v20  ;;  %v1086_v59 = vpop.f32.mrf.mxu0 }
 0x131   :  { %v1295_v63 = vpop.f32.mrf.mxu1 }
 0x132   :  { %vm1795_vm11 = vcmp.ge.f32.partialorder %v1731_v21, 0.0  ;;  %v1859_v41 = vmul.f32 0.01, %v1731_v21  ;;  %v1296_v5 = vadd.f32 %v1295_v63, %v1086_v59  ;;  %v129_v63 = vld [vmem:[%s3393_s0 + $0x378] sm:$0xff] }
 0x133   :  { %1133 = vmatmul.f32.gmra.mxu0 %v696_v0  ;;  %vm321_vm7 = vcmp.ge.f32.partialorder %v129_v63, 0.0 }
 0x134   :  { %2105 = vmatmul.msk.f32.gmra.mxu3 %vm822_vm1, %v755_v16  ;;  %v1923_v24 = vsel %vm1795_vm11, %v1731_v21, %v1859_v41  ;;  %v1505_v45 = vadd.f32 %v2965_v11, %v1296_v5  ;;  %1342 = vmatmul.f32.gmra.mxu1 %v697_v34  ;;  %v702_v16 = vsel %vm318_vm2, %v126_v60, %v510_v58  ;;  %v188_v41 = vld [vmem:[%s3393_s0 + $0x550] sm:$0xff] }
 0x135   :  { %2089 = vmatmul.msk.f32.gmra.mxu2 %vm822_vm1, %v707_v37  ;;  %1987 = vst [vmem:[#allocation2 + $0x88] sm:$0xff] %v1923_v24  ;;  %v703_v37 = vsel %vm319_vm4, %v127_v3, %v511_v15  ;;  %v513_v24 = vmul.f32 0.01, %v129_v63  ;;  %v572_v53 = vmul.f32 0.01, %v188_v41  ;;  %vm380_vm8 = vcmp.ge.f32.partialorder %v188_v41, 0.0 }
 0x136   :  { %v1664_v36 = vmul.f32 %v2986_v43, %v1505_v45  ;;  %v706_v3 = vsel %vm322_vm9, %v130_v14, %v514_v27 }
 0x137   :  { %v3036_v30 = vpop.f32.mrf.mxu3  ;;  %v705_v60 = vsel %vm321_vm7, %v129_v63, %v513_v24 }
 0x138   :  { %v3038_v55 = vpop.f32.mrf.mxu2  ;;  %v1732_v56 = vadd.f32 %v2996_v54, %v1664_v36  ;;  %v1089_v11 = vpop.f32.mrf.mxu0  ;;  %v524_v36 = vmul.f32 0.01, %v140_v22 }
 0x139   :  { %v1298_v61 = vpop.f32.mrf.mxu1 }
 0x13a   :  { %vm1796_vm0 = vcmp.ge.f32.partialorder %v1732_v56, 0.0  ;;  %v1860_v46 = vmul.f32 0.01, %v1732_v56  ;;  %v1299_v9 = vadd.f32 %v1298_v61, %v1089_v11  ;;  %v764_v61 = vsel %vm380_vm8, %v188_v41, %v572_v53 }
 0x13b   :  { %1136 = vmatmul.f32.gmra.mxu0 %v699_v51  ;;  %v716_v6 = vsel %vm332_vm10, %v140_v22, %v524_v36  ;;  %v194_v22 = vld [vmem:[%s3393_s0 + $0x580] sm:$0xff] }
 0x13c   :  { %2106 = vmatmul.msk.f32.gmra.mxu3 %vm822_vm1, %v758_v40  ;;  %v1924_v2 = vsel %vm1796_vm0, %v1732_v56, %v1860_v46  ;;  %v1508_v4 = vadd.f32 %v2991_v31, %v1299_v9  ;;  %1345 = vmatmul.f32.gmra.mxu1 %v700_v38  ;;  %v132_v38 = vld [vmem:[%s3393_s0 + $0x390] sm:$0xff]  ;;  %v133_v46 = vld [vmem:[%s3393_s0 + $0x398] sm:$0xff]  ;;  %v191_v9 = vld [vmem:[%s3393_s0 + $0x568] sm:$0xff]  ;;  %vm386_vm3 = vcmp.ge.f32.partialorder %v194_v22, 0.0 }
 0x13d   :  { %2090 = vmatmul.msk.f32.gmra.mxu2 %vm822_vm1, %v710_v49  ;;  %1988 = vst [vmem:[#allocation2 + $0x90] sm:$0xff] %v1924_v2  ;;  %v143_v2 = vld [vmem:[%s3393_s0 + $0x3e8] sm:$0xff]  ;;  %v517_v18 = vmul.f32 0.01, %v133_v46  ;;  %vm324_vm12 = vcmp.ge.f32.partialorder %v132_v38, 0.0  ;;  %vm383_vm13 = vcmp.ge.f32.partialorder %v191_v9, 0.0 }
 0x13e   :  { %v1665_v20 = vmul.f32 %v2986_v43, %v1508_v4  ;;  %v516_v4 = vmul.f32 0.01, %v132_v38  ;;  %vm325_vm14 = vcmp.ge.f32.partialorder %v133_v46, 0.0  ;;  %vm335_vm15 = vcmp.ge.f32.partialorder %v143_v2, 0.0 }
 0x13f   :  { %v3057_v21 = vpop.f32.mrf.mxu3  ;;  %v709_v41 = vsel %vm325_vm14, %v133_v46, %v517_v18  ;;  %v138_v46 = vld [vmem:[%s3393_s0 + $0x3c0] sm:$0xff]  ;;  %v149_v18 = vld [vmem:[%s3393_s0 + $0x418] sm:$0xff] }
 0x140   :  { %v3059_v59 = vpop.f32.mrf.mxu2  ;;  %v1733_v0 = vadd.f32 %v2996_v54, %v1665_v20  ;;  %v1092_v31 = vpop.f32.mrf.mxu0  ;;  %v575_v20 = vmul.f32 0.01, %v191_v9  ;;  %vm330_vm7 = vcmp.ge.f32.partialorder %v138_v46, 0.0  ;;  %vm341_vm10 = vcmp.ge.f32.partialorder %v149_v18, 0.0 }
 0x141   :  { %v1301_v34 = vpop.f32.mrf.mxu1 }
 0x142   :  { %vm1797_vm6 = vcmp.ge.f32.partialorder %v1733_v0, 0.0  ;;  %v1861_v5 = vmul.f32 0.01, %v1733_v0  ;;  %v1302_v23 = vadd.f32 %v1301_v34, %v1092_v31  ;;  %v708_v34 = vsel %vm324_vm12, %v132_v38, %v516_v4  ;;  %v197_v4 = vld [vmem:[%s3393_s0 + $0x598] sm:$0xff] }
 0x143   :  { %1139 = vmatmul.f32.gmra.mxu0 %v702_v16  ;;  %vm389_vm8 = vcmp.ge.f32.partialorder %v197_v4, 0.0 }
 0x144   :  { %2107 = vmatmul.msk.f32.gmra.mxu3 %vm822_vm1, %v761_v32  ;;  %v1925_v45 = vsel %vm1797_vm6, %v1733_v0, %v1861_v5  ;;  %v1511_v47 = vadd.f32 %v3017_v13, %v1302_v23  ;;  %1348 = vmatmul.f32.gmra.mxu1 %v703_v37  ;;  %v527_v0 = vmul.f32 0.01, %v143_v2  ;;  %v767_v37 = vsel %vm383_vm13, %v191_v9, %v575_v20  ;;  %v136_v23 = vld [vmem:[%s3393_s0 + $0x3b0] sm:$0xff] }
 0x145   :  { %2091 = vmatmul.msk.f32.gmra.mxu2 %vm822_vm1, %v713_v28  ;;  %1989 = vst [vmem:[#allocation2 + $0x98] sm:$0xff] %v1925_v45  ;;  %v135_v28 = vld [vmem:[%s3393_s0 + $0x3a8] sm:$0xff]  ;;  %vm328_vm4 = vcmp.ge.f32.partialorder %v136_v23, 0.0  ;;  %v522_v20 = vmul.f32 0.01, %v138_v46 }
 0x146   :  { %v1666_v56 = vmul.f32 %v2986_v43, %v1511_v47  ;;  %v719_v5 = vsel %vm335_vm15, %v143_v2, %v527_v0  ;;  %v146_v47 = vld [vmem:[%s3393_s0 + $0x400] sm:$0xff]  ;;  %v519_v27 = vmul.f32 0.01, %v135_v28  ;;  %vm327_vm2 = vcmp.ge.f32.partialorder %v135_v28, 0.0  ;;  %v139_v2 = vld [vmem:[%s3393_s0 + $0x3c8] sm:$0xff] }
 0x147   :  { %v3078_v11 = vpop.f32.mrf.mxu3  ;;  %vm338_vm5 = vcmp.ge.f32.partialorder %v146_v47, 0.0  ;;  %vm331_vm9 = vcmp.ge.f32.partialorder %v139_v2, 0.0 }
 0x148   :  { %v3080_v51 = vpop.f32.mrf.mxu2  ;;  %v1734_v40 = vadd.f32 %v2996_v54, %v1666_v56  ;;  %v1095_v13 = vpop.f32.mrf.mxu0  ;;  %v520_v56 = vmul.f32 0.01, %v136_v23 }
 0x149   :  { %v1304_v49 = vpop.f32.mrf.mxu1 }
 0x14a   :  { %vm1798_vm11 = vcmp.ge.f32.partialorder %v1734_v40, 0.0  ;;  %v1862_v52 = vmul.f32 0.01, %v1734_v40  ;;  %v1305_v58 = vadd.f32 %v1304_v49, %v1095_v13  ;;  %v530_v13 = vmul.f32 0.01, %v146_v47 }
 0x14b   :  { %1142 = vmatmul.f32.gmra.mxu0 %v705_v60 }
 0x14c   :  { %2108 = vmatmul.msk.f32.gmra.mxu3 %vm822_vm1, %v764_v61  ;;  %v1926_v15 = vsel %vm1798_vm11, %v1734_v40, %v1862_v52  ;;  %v1514_v17 = vadd.f32 %v3038_v55, %v1305_v58  ;;  %1351 = vmatmul.f32.gmra.mxu1 %v706_v3  ;;  %v578_v40 = vmul.f32 0.01, %v194_v22  ;;  %v711_v3 = vsel %vm327_vm2, %v135_v28, %v519_v27  ;;  %v142_v27 = vld [vmem:[%s3393_s0 + $0x3e0] sm:$0xff] }
 0x14d   :  { %2092 = vmatmul.msk.f32.gmra.mxu2 %vm822_vm1, %v716_v6  ;;  %1990 = vst [vmem:[#allocation2 + $0xa0] sm:$0xff] %v1926_v15  ;;  %v712_v52 = vsel %vm328_vm4, %v136_v23, %v520_v56  ;;  %v722_v58 = vsel %vm338_vm5, %v146_v47, %v530_v13  ;;  %vm334_vm14 = vcmp.ge.f32.partialorder %v142_v27, 0.0 }
 0x14e   :  { %v1667_v31 = vmul.f32 %v2986_v43, %v1514_v17  ;;  %v770_v6 = vsel %vm386_vm3, %v194_v22, %v578_v40  ;;  %v141_v22 = vld [vmem:[%s3393_s0 + $0x3d8] sm:$0xff]  ;;  %v152_v40 = vld [vmem:[%s3393_s0 + $0x430] sm:$0xff] }
 0x14f   :  { %v3099_v16 = vpop.f32.mrf.mxu3  ;;  %v525_v13 = vmul.f32 0.01, %v141_v22  ;;  %vm333_vm12 = vcmp.ge.f32.partialorder %v141_v22, 0.0  ;;  %vm344_vm15 = vcmp.ge.f32.partialorder %v152_v40, 0.0 }
 0x150   :  { %v3101_v32 = vpop.f32.mrf.mxu2  ;;  %v1735_v63 = vadd.f32 %v2996_v54, %v1667_v31  ;;  %v1098_v55 = vpop.f32.mrf.mxu0 }
 0x151   :  { %v1307_v14 = vpop.f32.mrf.mxu1 }
 0x152   :  { %vm1799_vm0 = vcmp.ge.f32.partialorder %v1735_v63, 0.0  ;;  %v1863_v24 = vmul.f32 0.01, %v1735_v63  ;;  %v1308_v45 = vadd.f32 %v1307_v14, %v1098_v55  ;;  %v581_v55 = vmul.f32 0.01, %v197_v4 }
 0x153   :  { %1145 = vmatmul.f32.gmra.mxu0 %v708_v34  ;;  %v533_v34 = vmul.f32 0.01, %v149_v18 }
 0x154   :  { %2109 = vmatmul.msk.f32.gmra.mxu3 %vm822_vm1, %v767_v37  ;;  %v1927_v53 = vsel %vm1799_vm0, %v1735_v63, %v1863_v24  ;;  %v1517_v36 = vadd.f32 %v3059_v59, %v1308_v45  ;;  %1354 = vmatmul.f32.gmra.mxu1 %v709_v41  ;;  %v523_v63 = vmul.f32 0.01, %v139_v2  ;;  %v773_v23 = vsel %vm389_vm8, %v197_v4, %v581_v55 }
 0x155   :  { %2093 = vmatmul.msk.f32.gmra.mxu2 %vm822_vm1, %v719_v5  ;;  %1991 = vst [vmem:[#allocation2 + $0xa8] sm:$0xff] %v1927_v53  ;;  %v714_v5 = vsel %vm330_vm7, %v138_v46, %v522_v20  ;;  %v725_v47 = vsel %vm341_vm10, %v149_v18, %v533_v34  ;;  %v200_v53 = vld [vmem:[%s3393_s0 + $0x5b0] sm:$0xff]  ;;  %v155_v34 = vld [vmem:[%s3393_s0 + $0x448] sm:$0xff] }
 0x156   :  { %v1668_v60 = vmul.f32 %v2986_v43, %v1517_v36  ;;  %v715_v45 = vsel %vm331_vm9, %v139_v2, %v523_v63  ;;  %vm392_vm13 = vcmp.ge.f32.partialorder %v200_v53, 0.0  ;;  %v717_v2 = vsel %vm333_vm12, %v141_v22, %v525_v13 }
 0x157   :  { %v3120_v61 = vpop.f32.mrf.mxu3  ;;  %v539_v22 = vmul.f32 0.01, %v155_v34  ;;  %vm347_vm5 = vcmp.ge.f32.partialorder %v155_v34, 0.0 }
 0x158   :  { %v3122_v38 = vpop.f32.mrf.mxu2  ;;  %v1736_v49 = vadd.f32 %v2996_v54, %v1668_v60  ;;  %v1101_v59 = vpop.f32.mrf.mxu0 }
 0x159   :  { %v1310_v9 = vpop.f32.mrf.mxu1 }
 0x15a   :  { %vm1800_vm6 = vcmp.ge.f32.partialorder %v1736_v49, 0.0  ;;  %v1864_v15 = vmul.f32 0.01, %v1736_v49  ;;  %v1311_v17 = vadd.f32 %v1310_v9, %v1101_v59  ;;  %v526_v59 = vmul.f32 0.01, %v142_v27 }
 0x15b   :  { %1148 = vmatmul.f32.gmra.mxu0 %v711_v3  ;;  %v584_v3 = vmul.f32 0.01, %v200_v53 }
 0x15c   :  { %2110 = vmatmul.msk.f32.gmra.mxu3 %vm822_vm1, %v770_v6  ;;  %v1928_v0 = vsel %vm1800_vm6, %v1736_v49, %v1864_v15  ;;  %v1520_v31 = vadd.f32 %v3080_v51, %v1311_v17  ;;  %1357 = vmatmul.f32.gmra.mxu1 %v712_v52  ;;  %v536_v6 = vmul.f32 0.01, %v152_v40  ;;  %v144_v15 = vld [vmem:[%s3393_s0 + $0x3f0] sm:$0xff]  ;;  %v718_v18 = vsel %vm334_vm14, %v142_v27, %v526_v59  ;;  %v206_v59 = vld [vmem:[%s3393_s0 + $0x5e0] sm:$0xff] }
 0x15d   :  { %2094 = vmatmul.msk.f32.gmra.mxu2 %vm822_vm1, %v722_v58  ;;  %1992 = vst [vmem:[#allocation2 + $0xb0] sm:$0xff] %v1928_v0  ;;  %v776_v4 = vsel %vm392_vm13, %v200_v53, %v584_v3  ;;  %v145_v0 = vld [vmem:[%s3393_s0 + $0x3f8] sm:$0xff]  ;;  %vm336_vm2 = vcmp.ge.f32.partialorder %v144_v15, 0.0  ;;  %vm398_vm8 = vcmp.ge.f32.partialorder %v206_v59, 0.0 }
 0x15e   :  { %v1669_v37 = vmul.f32 %v2986_v43, %v1520_v31  ;;  %v728_v20 = vsel %vm344_vm15, %v152_v40, %v536_v6  ;;  %v203_v31 = vld [vmem:[%s3393_s0 + $0x5c8] sm:$0xff]  ;;  %vm337_vm4 = vcmp.ge.f32.partialorder %v145_v0, 0.0 }
 0x15f   :  { %v3141_v28 = vpop.f32.mrf.mxu3  ;;  %vm395_vm3 = vcmp.ge.f32.partialorder %v203_v31, 0.0 }
 0x160   :  { %v3143_v14 = vpop.f32.mrf.mxu2  ;;  %v1737_v41 = vadd.f32 %v2996_v54, %v1669_v37  ;;  %v1104_v51 = vpop.f32.mrf.mxu0  ;;  %v528_v37 = vmul.f32 0.01, %v144_v15 }
 0x161   :  { %v1313_v24 = vpop.f32.mrf.mxu1 }
 0x162   :  { %vm1801_vm11 = vcmp.ge.f32.partialorder %v1737_v41, 0.0  ;;  %v1865_v36 = vmul.f32 0.01, %v1737_v41  ;;  %v1314_v56 = vadd.f32 %v1313_v24, %v1104_v51  ;;  %v720_v53 = vsel %vm336_vm2, %v144_v15, %v528_v37 }
 0x163   :  { %1151 = vmatmul.f32.gmra.mxu0 %v714_v5  ;;  %v529_v5 = vmul.f32 0.01, %v145_v0  ;;  %v590_v15 = vmul.f32 0.01, %v206_v59 }
 0x164   :  { %2111 = vmatmul.msk.f32.gmra.mxu3 %vm822_vm1, %v773_v23  ;;  %v1929_v60 = vsel %vm1801_vm11, %v1737_v41, %v1865_v36  ;;  %v1523_v49 = vadd.f32 %v3101_v32, %v1314_v56  ;;  %1360 = vmatmul.f32.gmra.mxu1 %v715_v45  ;;  %v587_v23 = vmul.f32 0.01, %v203_v31  ;;  %v147_v56 = vld [vmem:[%s3393_s0 + $0x408] sm:$0xff] }
 0x165   :  { %2095 = vmatmul.msk.f32.gmra.mxu2 %vm822_vm1, %v725_v47  ;;  %1993 = vst [vmem:[#allocation2 + $0xb8] sm:$0xff] %v1929_v60  ;;  %v721_v13 = vsel %vm337_vm4, %v145_v0, %v529_v5  ;;  %v731_v60 = vsel %vm347_vm5, %v155_v34, %v539_v22  ;;  %vm339_vm7 = vcmp.ge.f32.partialorder %v147_v56, 0.0  ;;  %v150_v34 = vld [vmem:[%s3393_s0 + $0x420] sm:$0xff]  ;;  %v151_v5 = vld [vmem:[%s3393_s0 + $0x428] sm:$0xff] }
 0x166   :  { %v1670_v46 = vmul.f32 %v2986_v43, %v1523_v49  ;;  %v779_v36 = vsel %vm395_vm3, %v203_v31, %v587_v23  ;;  %v148_v49 = vld [vmem:[%s3393_s0 + $0x410] sm:$0xff]  ;;  %v209_v23 = vld [vmem:[%s3393_s0 + $0x5f8] sm:$0xff]  ;;  %vm342_vm12 = vcmp.ge.f32.partialorder %v150_v34, 0.0  ;;  %vm343_vm14 = vcmp.ge.f32.partialorder %v151_v5, 0.0 }
 0x167   :  { %v3162_v9 = vpop.f32.mrf.mxu3  ;;  %vm340_vm9 = vcmp.ge.f32.partialorder %v148_v49, 0.0  ;;  %vm401_vm13 = vcmp.ge.f32.partialorder %v209_v23, 0.0 }
 0x168   :  { %v3164_v52 = vpop.f32.mrf.mxu2  ;;  %v1738_v58 = vadd.f32 %v2996_v54, %v1670_v46  ;;  %v1107_v32 = vpop.f32.mrf.mxu0  ;;  %v158_v46 = vld [vmem:[%s3393_s0 + $0x460] sm:$0xff] }
 0x169   :  { %v1316_v17 = vpop.f32.mrf.mxu1  ;;  %vm350_vm10 = vcmp.ge.f32.partialorder %v158_v46, 0.0 }
 0x16a   :  { %vm1802_vm0 = vcmp.ge.f32.partialorder %v1738_v58, 0.0  ;;  %v1866_v63 = vmul.f32 0.01, %v1738_v58  ;;  %v1317_v55 = vadd.f32 %v1316_v17, %v1107_v32  ;;  %v542_v17 = vmul.f32 0.01, %v158_v46 }
 0x16b   :  { %1154 = vmatmul.f32.gmra.mxu0 %v717_v2 }
 0x16c   :  { %2112 = vmatmul.msk.f32.gmra.mxu3 %vm822_vm1, %v776_v4  ;;  %v1930_v41 = vsel %vm1802_vm0, %v1738_v58, %v1866_v63  ;;  %v1526_v51 = vadd.f32 %v3122_v38, %v1317_v55  ;;  %1363 = vmatmul.f32.gmra.mxu1 %v718_v18  ;;  %v531_v58 = vmul.f32 0.01, %v147_v56  ;;  %v532_v4 = vmul.f32 0.01, %v148_v49 }
 0x16d   :  { %2096 = vmatmul.msk.f32.gmra.mxu2 %vm822_vm1, %v728_v20  ;;  %1994 = vst [vmem:[#allocation2 + $0xc0] sm:$0xff] %v1930_v41  ;;  %v782_v55 = vsel %vm398_vm8, %v206_v59, %v590_v15 }
 0x16e   :  { %v1671_v24 = vmul.f32 %v2986_v43, %v1526_v51  ;;  %v723_v63 = vsel %vm339_vm7, %v147_v56, %v531_v58  ;;  %v724_v41 = vsel %vm340_vm9, %v148_v49, %v532_v4  ;;  %v734_v51 = vsel %vm350_vm10, %v158_v46, %v542_v17  ;;  %v153_v4 = vld [vmem:[%s3393_s0 + $0x438] sm:$0xff] }
 0x16f   :  { %v3183_v45 = vpop.f32.mrf.mxu3  ;;  %v535_v56 = vmul.f32 0.01, %v151_v5  ;;  %vm345_vm2 = vcmp.ge.f32.partialorder %v153_v4, 0.0 }
 0x170   :  { %v3185_v47 = vpop.f32.mrf.mxu2  ;;  %v1739_v27 = vadd.f32 %v2996_v54, %v1671_v24  ;;  %v1110_v38 = vpop.f32.mrf.mxu0 }
 0x171   :  { %v1319_v40 = vpop.f32.mrf.mxu1 }
 0x172   :  { %vm1803_vm6 = vcmp.ge.f32.partialorder %v1739_v27, 0.0  ;;  %v1867_v3 = vmul.f32 0.01, %v1739_v27  ;;  %v1320_v6 = vadd.f32 %v1319_v40, %v1110_v38  ;;  %v534_v38 = vmul.f32 0.01, %v150_v34 }
 0x173   :  { %1157 = vmatmul.f32.gmra.mxu0 %v720_v53  ;;  %v593_v40 = vmul.f32 0.01, %v209_v23 }
 0x174   :  { %2113 = vmatmul.msk.f32.gmra.mxu3 %vm822_vm1, %v779_v36  ;;  %v1931_v32 = vsel %vm1803_vm6, %v1739_v27, %v1867_v3  ;;  %v1529_v2 = vadd.f32 %v3143_v14, %v1320_v6  ;;  %1366 = vmatmul.f32.gmra.mxu1 %v721_v13  ;;  %v161_v27 = vld [vmem:[%s3393_s0 + $0x478] sm:$0xff]  ;;  %v726_v6 = vsel %vm342_vm12, %v150_v34, %v534_v38 }
 0x175   :  { %2097 = vmatmul.msk.f32.gmra.mxu2 %vm822_vm1, %v731_v60  ;;  %1995 = vst [vmem:[#allocation2 + $0xc8] sm:$0xff] %v1931_v32  ;;  %v545_v13 = vmul.f32 0.01, %v161_v27  ;;  %vm353_vm15 = vcmp.ge.f32.partialorder %v161_v27, 0.0  ;;  %v785_v46 = vsel %vm401_vm13, %v209_v23, %v593_v40  ;;  %v727_v32 = vsel %vm343_vm14, %v151_v5, %v535_v56  ;;  %v157_v40 = vld [vmem:[%s3393_s0 + $0x458] sm:$0xff] }
 0x176   :  { %v1672_v18 = vmul.f32 %v2986_v43, %v1529_v2  ;;  %vm349_vm7 = vcmp.ge.f32.partialorder %v157_v40, 0.0 }
 0x177   :  { %v3204_v20 = vpop.f32.mrf.mxu3  ;;  %v737_v2 = vsel %vm353_vm15, %v161_v27, %v545_v13  ;;  %v167_v13 = vld [vmem:[%s3393_s0 + $0x4a8] sm:$0xff] }
 0x178   :  { %v3206_v0 = vpop.f32.mrf.mxu2  ;;  %v1740_v31 = vadd.f32 %v2996_v54, %v1672_v18  ;;  %v1113_v14 = vpop.f32.mrf.mxu0  ;;  %v154_v18 = vld [vmem:[%s3393_s0 + $0x440] sm:$0xff]  ;;  %vm359_vm8 = vcmp.ge.f32.partialorder %v167_v13, 0.0 }
 0x179   :  { %v1322_v37 = vpop.f32.mrf.mxu1  ;;  %v538_v34 = vmul.f32 0.01, %v154_v18  ;;  %vm346_vm3 = vcmp.ge.f32.partialorder %v154_v18, 0.0 }
 0x17a   :  { %vm1804_vm11 = vcmp.ge.f32.partialorder %v1740_v31, 0.0  ;;  %v1868_v22 = vmul.f32 0.01, %v1740_v31  ;;  %v1323_v24 = vadd.f32 %v1322_v37, %v1113_v14 }
 0x17b   :  { %1160 = vmatmul.f32.gmra.mxu0 %v723_v63  ;;  %v730_v27 = vsel %vm346_vm3, %v154_v18, %v538_v34  ;;  %v160_v34 = vld [vmem:[%s3393_s0 + $0x470] sm:$0xff] }
 0x17c   :  { %2114 = vmatmul.msk.f32.gmra.mxu3 %vm822_vm1, %v782_v55  ;;  %v1932_v53 = vsel %vm1804_vm11, %v1740_v31, %v1868_v22  ;;  %v1532_v36 = vadd.f32 %v3164_v52, %v1323_v24  ;;  %1369 = vmatmul.f32.gmra.mxu1 %v724_v41  ;;  %v164_v31 = vld [vmem:[%s3393_s0 + $0x490] sm:$0xff]  ;;  %v537_v55 = vmul.f32 0.01, %v153_v4  ;;  %vm352_vm11 = vcmp.ge.f32.partialorder %v160_v34, 0.0 }
 0x17d   :  { %2098 = vmatmul.msk.f32.gmra.mxu2 %vm822_vm1, %v734_v51  ;;  %1996 = vst [vmem:[#allocation2 + $0xd0] sm:$0xff] %v1932_v53  ;;  %v548_v37 = vmul.f32 0.01, %v164_v31  ;;  %vm356_vm4 = vcmp.ge.f32.partialorder %v164_v31, 0.0  ;;  %v156_v53 = vld [vmem:[%s3393_s0 + $0x450] sm:$0xff] }
 0x17e   :  { %v1673_v60 = vmul.f32 %v2986_v43, %v1532_v36  ;;  %vm348_vm6 = vcmp.ge.f32.partialorder %v156_v53, 0.0 }
 0x17f   :  { %v3225_v49 = vpop.f32.mrf.mxu3  ;;  %v740_v38 = vsel %vm356_vm4, %v164_v31, %v548_v37  ;;  %v170_v37 = vld [vmem:[%s3393_s0 + $0x4c0] sm:$0xff] }
 0x180   :  { %v3227_v59 = vpop.f32.mrf.mxu2  ;;  %v1741_v3 = vadd.f32 %v2996_v54, %v1673_v60  ;;  %v1116_v52 = vpop.f32.mrf.mxu0  ;;  %vm362_vm12 = vcmp.ge.f32.partialorder %v170_v37, 0.0 }
 0x181   :  { %v1325_v58 = vpop.f32.mrf.mxu1 }
 0x182   :  { %vm1805_vm0 = vcmp.ge.f32.partialorder %v1741_v3, 0.0  ;;  %v1869_v15 = vmul.f32 0.01, %v1741_v3  ;;  %v1326_v17 = vadd.f32 %v1325_v58, %v1116_v52  ;;  %v540_v52 = vmul.f32 0.01, %v156_v53 }
 0x183   :  { %1163 = vmatmul.f32.gmra.mxu0 %v726_v6  ;;  %v541_v6 = vmul.f32 0.01, %v157_v40 }
 0x184   :  { %2115 = vmatmul.msk.f32.gmra.mxu3 %vm822_vm1, %v785_v46  ;;  %v1933_v14 = vsel %vm1805_vm0, %v1741_v3, %v1869_v15  ;;  %v1535_v63 = vadd.f32 %v3185_v47, %v1326_v17  ;;  %1372 = vmatmul.f32.gmra.mxu1 %v727_v32  ;;  %v729_v47 = vsel %vm345_vm2, %v153_v4, %v537_v55  ;;  %v551_v46 = vmul.f32 0.01, %v167_v13 }
 0x185   :  { %2099 = vmatmul.msk.f32.gmra.mxu2 %vm822_vm1, %v737_v2  ;;  %1997 = vst [vmem:[#allocation2 + $0xd8] sm:$0xff] %v1933_v14  ;;  %v732_v17 = vsel %vm348_vm6, %v156_v53, %v540_v52  ;;  %v733_v18 = vsel %vm349_vm7, %v157_v40, %v541_v6  ;;  %v159_v14 = vld [vmem:[%s3393_s0 + $0x468] sm:$0xff] }
 0x186   :  { %v1674_v41 = vmul.f32 %v2986_v43, %v1535_v63  ;;  %v743_v31 = vsel %vm359_vm8, %v167_v13, %v551_v46  ;;  %vm351_vm10 = vcmp.ge.f32.partialorder %v159_v14, 0.0 }
 0x187   :  { %v3243_v51 = vpop.f32.mrf.mxu3 }
 0x188   :  { %v3245_v5 = vpop.f32.mrf.mxu2  ;;  %v1742_v23 = vadd.f32 %v2996_v54, %v1674_v41  ;;  %v1119_v22 = vpop.f32.mrf.mxu0 }
 0x189   :  { %v1328_v24 = vpop.f32.mrf.mxu1 }
 0x18a   :  { %vm1806_vm5 = vcmp.ge.f32.partialorder %v1742_v23, 0.0  ;;  %v1870_v36 = vmul.f32 0.01, %v1742_v23  ;;  %v1329_v56 = vadd.f32 %v1328_v24, %v1119_v22  ;;  %v543_v22 = vmul.f32 0.01, %v159_v14 }
 0x18b   :  { %1166 = vmatmul.f32.gmra.mxu0 %v729_v47  ;;  %v544_v47 = vmul.f32 0.01, %v160_v34  ;;  %v554_v24 = vmul.f32 0.01, %v170_v37 }
 0x18c   :  { %v1934_v60 = vsel %vm1806_vm5, %v1742_v23, %v1870_v36  ;;  %v1538_v3 = vadd.f32 %v3206_v0, %v1329_v56  ;;  %1375 = vmatmul.f32.gmra.mxu1 %v730_v27  ;;  %v735_v40 = vsel %vm351_vm10, %v159_v14, %v543_v22 }
 0x18d   :  { %2100 = vmatmul.msk.f32.gmra.mxu2 %vm822_vm1, %v740_v38  ;;  %1998 = vst [vmem:[#allocation2 + $0xe0] sm:$0xff] %v1934_v60  ;;  %v736_v13 = vsel %vm352_vm11, %v160_v34, %v544_v47  ;;  %v746_v60 = vsel %vm362_vm12, %v170_v37, %v554_v24 }
 0x18e   :  { %v1675_v58 = vmul.f32 %v2986_v43, %v1538_v3 }
 0x18f   :  { %v3260_v32 = vpop.f32.mrf.mxu3 }
 0x190   :  { %v1546_v2 = vpop.f32.mrf.mxu2  ;;  %v1743_v4 = vadd.f32 %v2996_v54, %v1675_v58  ;;  %v1122_v15 = vpop.f32.mrf.mxu0 }
 0x191   :  { %v1331_v0 = vpop.f32.mrf.mxu1 }
 0x192   :  { %vm1807_vm9 = vcmp.ge.f32.partialorder %v1743_v4, 0.0  ;;  %v1871_v63 = vmul.f32 0.01, %v1743_v4  ;;  %v1332_v55 = vadd.f32 %v1331_v0, %v1122_v15 }
 0x193   :  { %1169 = vmatmul.f32.gmra.mxu0 %v732_v17 }
 0x194   :  { %v1935_v41 = vsel %vm1807_vm9, %v1743_v4, %v1871_v63  ;;  %v1541_v23 = vadd.f32 %v3227_v59, %v1332_v55  ;;  %1378 = vmatmul.f32.gmra.mxu1 %v733_v18 }
 0x195   :  { %2101 = vmatmul.msk.f32.gmra.mxu2 %vm822_vm1, %v743_v31  ;;  %1999 = vst [vmem:[#allocation2 + $0xe8] sm:$0xff] %v1935_v41 }
 0x196   :  { %v1676_v27 = vmul.f32 %v2986_v43, %v1541_v23 }
 0x197   :  { %v3275_v38 = vpop.f32.mrf.mxu3 }
 0x198   :  { %v1549_v53 = vpop.f32.mrf.mxu2  ;;  %v1744_v36 = vadd.f32 %v2996_v54, %v1676_v27  ;;  %v1125_v56 = vpop.f32.mrf.mxu0 }
 0x199   :  { %v1334_v59 = vpop.f32.mrf.mxu1 }
 0x19a   :  { %vm1808_vm13 = vcmp.ge.f32.partialorder %v1744_v36, 0.0  ;;  %v1872_v3 = vmul.f32 0.01, %v1744_v36  ;;  %v1335_v52 = vadd.f32 %v1334_v59, %v1125_v56 }
 0x19b   :  { %1172 = vmatmul.f32.gmra.mxu0 %v735_v40 }
 0x19c   :  { %v1936_v6 = vsel %vm1808_vm13, %v1744_v36, %v1872_v3  ;;  %v1544_v46 = vadd.f32 %v3245_v5, %v1335_v52  ;;  %1381 = vmatmul.f32.gmra.mxu1 %v736_v13  ;;  %v1395_v5 = vadd.f32 %v3057_v21, %v2723_v26  ;;  %v1398_v26 = vadd.f32 %v3078_v11, %v2743_v50 }
 0x19d   :  { %2102 = vmatmul.msk.f32.gmra.mxu2 %vm822_vm1, %v746_v60  ;;  %2000 = vst [vmem:[#allocation2 + $0xf0] sm:$0xff] %v1936_v6 }
 0x19e   :  { %v1677_v58 = vmul.f32 %v2986_v43, %v1544_v46 }
 0x19f   :  { %v3281_v4 = vpop.f32.mrf.mxu3 }
 0x1a0   :  { %v1552_v15 = vpop.f32.mrf.mxu2  ;;  %v1745_v17 = vadd.f32 %v2996_v54, %v1677_v58  ;;  %v1128_v0 = vpop.f32.mrf.mxu0 }
 0x1a1   :  { %v1337_v18 = vpop.f32.mrf.mxu1 }
 0x1a2   :  { %vm1809_vm14 = vcmp.ge.f32.partialorder %v1745_v17, 0.0  ;;  %v1873_v31 = vmul.f32 0.01, %v1745_v17  ;;  %v1338_v14 = vadd.f32 %v1337_v18, %v1128_v0 }
 0x1a4   :  { %v1937_v63 = vsel %vm1809_vm14, %v1745_v17, %v1873_v31  ;;  %v1547_v55 = vadd.f32 %v1546_v2, %v1338_v14  ;;  %v1401_v14 = vadd.f32 %v3099_v16, %v2763_v10 }
 0x1a5   :  { %2001 = vst [vmem:[#allocation2 + $0xf8] sm:$0xff] %v1937_v63 }
 0x1a6   :  { %v1678_v34 = vmul.f32 %v2986_v43, %v1547_v55 }
 0x1a7   :  { %v1603_v37 = vpop.f32.mrf.mxu3 }
 0x1a8   :  { %v1555_v41 = vpop.f32.mrf.mxu2  ;;  %v1604_v23 = vadd.f32 %v1603_v37, %v1395_v5  ;;  %v1746_v22 = vadd.f32 %v2996_v54, %v1678_v34  ;;  %v1131_v47 = vpop.f32.mrf.mxu0 }
 0x1a9   :  { %v1340_v27 = vpop.f32.mrf.mxu1 }
 0x1aa   :  { %v1697_v24 = vmul.f32 %v2986_v43, %v1604_v23  ;;  %vm1810_vm1 = vcmp.ge.f32.partialorder %v1746_v22, 0.0  ;;  %v1874_v36 = vmul.f32 0.01, %v1746_v22  ;;  %v1341_v56 = vadd.f32 %v1340_v27, %v1131_v47 }
 0x1ac   :  { %v1765_v2 = vadd.f32 %v2996_v54, %v1697_v24  ;;  %v1938_v40 = vsel %vm1810_vm1, %v1746_v22, %v1874_v36  ;;  %v1550_v59 = vadd.f32 %v1549_v53, %v1341_v56 }
 0x1ad   :  { %2002 = vst [vmem:[#allocation2 + $0x100] sm:$0xff] %v1938_v40 }
 0x1ae   :  { %vm1829_vm15 = vcmp.ge.f32.partialorder %v1765_v2, 0.0  ;;  %v1893_v21 = vmul.f32 0.01, %v1765_v2  ;;  %v1679_v13 = vmul.f32 %v2986_v43, %v1550_v59 }
 0x1af   :  { %v1606_v60 = vpop.f32.mrf.mxu3 }
 0x1b0   :  { %v1957_v3 = vsel %vm1829_vm15, %v1765_v2, %v1893_v21  ;;  %v1558_v52 = vpop.f32.mrf.mxu2  ;;  %v1607_v6 = vadd.f32 %v1606_v60, %v1398_v26  ;;  %v1747_v46 = vadd.f32 %v2996_v54, %v1679_v13  ;;  %v1134_v58 = vpop.f32.mrf.mxu0  ;;  %v1404_v2 = vadd.f32 %v3120_v61, %v2783_v19 }
 0x1b1   :  { %2021 = vst [vmem:[#allocation2 + $0x198] sm:$0xff] %v1957_v3  ;;  %v1343_v0 = vpop.f32.mrf.mxu1 }
 0x1b2   :  { %v1698_v17 = vmul.f32 %v2986_v43, %v1607_v6  ;;  %vm1811_vm0 = vcmp.ge.f32.partialorder %v1747_v46, 0.0  ;;  %v1875_v53 = vmul.f32 0.01, %v1747_v46  ;;  %v1344_v18 = vadd.f32 %v1343_v0, %v1134_v58 }
 0x1b4   :  { %v1766_v50 = vadd.f32 %v2996_v54, %v1698_v17  ;;  %v1939_v11 = vsel %vm1811_vm0, %v1747_v46, %v1875_v53  ;;  %v1553_v31 = vadd.f32 %v1552_v15, %v1344_v18  ;;  %v3303_v15 = vld [vmem:[%s3395_s2] ss:$0 sm:$0xff]  ;;  %v1407_v53 = vadd.f32 %v3141_v28, %v2803_v35  ;;  %s2187_s2 = smov [#allocation2]  }
 0x1b5   :  { %2003 = vst [vmem:[#allocation2 + $0x108] sm:$0xff] %v1939_v11 }
 0x1b6   :  { %vm1830_vm2 = vcmp.ge.f32.partialorder %v1766_v50, 0.0  ;;  %v1894_v63 = vmul.f32 0.01, %v1766_v50  ;;  %v1680_v55 = vmul.f32 %v2986_v43, %v1553_v31  ;;  %v3309_v43 = vld [vmem:[%s3396_s3] ss:$0 sm:$0xff]  ;;  %s2038_s3 = sshll.u32 %s2187_s2, 4  ;;  %s2039_s3 = int_to_ptr.vmem [resolvable:$true] %s2038_s3 }
 0x1b7   :  { %v1609_v5 = vpop.f32.mrf.mxu3 }
 0x1b8   :  { %v1958_v34 = vsel %vm1830_vm2, %v1766_v50, %v1894_v63  ;;  %v1561_v37 = vpop.f32.mrf.mxu2  ;;  %v1610_v23 = vadd.f32 %v1609_v5, %v1401_v14  ;;  %v1748_v22 = vadd.f32 %v2996_v54, %v1680_v55  ;;  %v1137_v47 = vpop.f32.mrf.mxu0 }
 0x1b9   :  { %2022 = vst [vmem:[#allocation2 + $0x1a0] sm:$0xff] %v1958_v34  ;;  %v1346_v16 = vpop.f32.mrf.mxu1 }
 0x1ba   :  { %v1699_v10 = vmul.f32 %v3303_v15, %v1610_v23  ;;  %vm1812_vm3 = vcmp.ge.f32.partialorder %v1748_v22, 0.0  ;;  %v1876_v24 = vmul.f32 0.01, %v1748_v22  ;;  %v1347_v27 = vadd.f32 %v1346_v16, %v1137_v47 }
 0x1bc   :  { %v1767_v36 = vadd.f32 %v3309_v43, %v1699_v10  ;;  %v1940_v54 = vsel %vm1812_vm3, %v1748_v22, %v1876_v24  ;;  %v1556_v56 = vadd.f32 %v1555_v41, %v1347_v27  ;;  %v1410_v10 = vadd.f32 %v3162_v9, %v2823_v8 }
 0x1bd   :  { %2004 = vst [vmem:[#allocation2 + $0x110] sm:$0xff] %v1940_v54 }
 0x1be   :  { %vm1831_vm4 = vcmp.ge.f32.partialorder %v1767_v36, 0.0  ;;  %v1895_v40 = vmul.f32 0.01, %v1767_v36  ;;  %v1681_v59 = vmul.f32 %v3303_v15, %v1556_v56 }
 0x1bf   :  { %v1612_v26 = vpop.f32.mrf.mxu3 }
 0x1c0   :  { %v1959_v21 = vsel %vm1831_vm4, %v1767_v36, %v1895_v40  ;;  %v1564_v13 = vpop.f32.mrf.mxu2  ;;  %v1613_v60 = vadd.f32 %v1612_v26, %v1404_v2  ;;  %v1749_v3 = vadd.f32 %v3309_v43, %v1681_v59  ;;  %v1140_v6 = vpop.f32.mrf.mxu0 }
 0x1c1   :  { %2023 = vst [vmem:[#allocation2 + $0x1a8] sm:$0xff] %v1959_v21  ;;  %v1349_v58 = vpop.f32.mrf.mxu1 }
 0x1c2   :  { %v1700_v46 = vmul.f32 %v3303_v15, %v1613_v60  ;;  %vm1813_vm5 = vcmp.ge.f32.partialorder %v1749_v3, 0.0  ;;  %v1877_v41 = vmul.f32 0.01, %v1749_v3  ;;  %v1350_v17 = vadd.f32 %v1349_v58, %v1140_v6 }
 0x1c4   :  { %v1768_v19 = vadd.f32 %v3309_v43, %v1700_v46  ;;  %v1941_v61 = vsel %vm1813_vm5, %v1749_v3, %v1877_v41  ;;  %v1559_v0 = vadd.f32 %v1558_v52, %v1350_v17  ;;  %v1413_v3 = vadd.f32 %v3183_v45, %v2843_v48 }
 0x1c5   :  { %2005 = vst [vmem:[#allocation2 + $0x118] sm:$0xff] %v1941_v61 }
 0x1c6   :  { %vm1832_vm6 = vcmp.ge.f32.partialorder %v1768_v19, 0.0  ;;  %v1896_v18 = vmul.f32 0.01, %v1768_v19  ;;  %v1682_v50 = vmul.f32 %v3303_v15, %v1559_v0 }
 0x1c7   :  { %v1615_v11 = vpop.f32.mrf.mxu3 }
 0x1c8   :  { %v1960_v31 = vsel %vm1832_vm6, %v1768_v19, %v1896_v18  ;;  %v1567_v14 = vpop.f32.mrf.mxu2  ;;  %v1616_v63 = vadd.f32 %v1615_v11, %v1407_v53  ;;  %v1750_v55 = vadd.f32 %v3309_v43, %v1682_v50  ;;  %v1143_v5 = vpop.f32.mrf.mxu0 }
 0x1c9   :  { %2024 = vst [vmem:[#allocation2 + $0x1b0] sm:$0xff] %v1960_v31  ;;  %v1352_v23 = vpop.f32.mrf.mxu1  ;;  %v1416_v31 = vadd.f32 %v3204_v20, %v2863_v1 }
 0x1ca   :  { %v1701_v34 = vmul.f32 %v3303_v15, %v1616_v63  ;;  %vm1814_vm7 = vcmp.ge.f32.partialorder %v1750_v55, 0.0  ;;  %v1878_v52 = vmul.f32 0.01, %v1750_v55  ;;  %v1353_v22 = vadd.f32 %v1352_v23, %v1143_v5 }
 0x1cc   :  { %v1769_v35 = vadd.f32 %v3309_v43, %v1701_v34  ;;  %v1942_v28 = vsel %vm1814_vm7, %v1750_v55, %v1878_v52  ;;  %v1562_v47 = vadd.f32 %v1561_v37, %v1353_v22 }
 0x1cd   :  { %2006 = vst [vmem:[#allocation2 + $0x120] sm:$0xff] %v1942_v28 }
 0x1ce   :  { %vm1833_vm8 = vcmp.ge.f32.partialorder %v1769_v35, 0.0  ;;  %v1897_v16 = vmul.f32 0.01, %v1769_v35  ;;  %v1683_v24 = vmul.f32 %v3303_v15, %v1562_v47 }
 0x1cf   :  { %v1618_v27 = vpop.f32.mrf.mxu3 }
 0x1d0   :  { %v1961_v36 = vsel %vm1833_vm8, %v1769_v35, %v1897_v16  ;;  %v1570_v54 = vpop.f32.mrf.mxu2  ;;  %v1619_v56 = vadd.f32 %v1618_v27, %v1410_v10  ;;  %v1751_v2 = vadd.f32 %v3309_v43, %v1683_v24  ;;  %v1146_v40 = vpop.f32.mrf.mxu0  ;;  %v1419_v24 = vadd.f32 %v3225_v49, %v2883_v39 }
 0x1d1   :  { %2025 = vst [vmem:[#allocation2 + $0x1b8] sm:$0xff] %v1961_v36  ;;  %v1355_v26 = vpop.f32.mrf.mxu1 }
 0x1d2   :  { %v1702_v59 = vmul.f32 %v3303_v15, %v1619_v56  ;;  %vm1815_vm9 = vcmp.ge.f32.partialorder %v1751_v2, 0.0  ;;  %v1879_v37 = vmul.f32 0.01, %v1751_v2  ;;  %v1356_v21 = vadd.f32 %v1355_v26, %v1146_v40 }
 0x1d4   :  { %v1770_v8 = vadd.f32 %v3309_v43, %v1702_v59  ;;  %v1943_v9 = vsel %vm1815_vm9, %v1751_v2, %v1879_v37  ;;  %v1565_v60 = vadd.f32 %v1564_v13, %v1356_v21 }
 0x1d5   :  { %2007 = vst [vmem:[#allocation2 + $0x128] sm:$0xff] %v1943_v9 }
 0x1d6   :  { %vm1834_vm10 = vcmp.ge.f32.partialorder %v1770_v8, 0.0  ;;  %v1898_v6 = vmul.f32 0.01, %v1770_v8  ;;  %v1684_v46 = vmul.f32 %v3303_v15, %v1565_v60 }
 0x1d7   :  { %v1621_v58 = vpop.f32.mrf.mxu3 }
 0x1d8   :  { %v1962_v41 = vsel %vm1834_vm10, %v1770_v8, %v1898_v6  ;;  %v1573_v17 = vpop.f32.mrf.mxu2  ;;  %v1622_v19 = vadd.f32 %v1621_v58, %v1413_v3  ;;  %v1752_v61 = vadd.f32 %v3309_v43, %v1684_v46  ;;  %v1149_v0 = vpop.f32.mrf.mxu0  ;;  %v1422_v3 = vadd.f32 %v3243_v51, %v2903_v62 }
 0x1d9   :  { %2026 = vst [vmem:[#allocation2 + $0x1c0] sm:$0xff] %v1962_v41  ;;  %v1358_v18 = vpop.f32.mrf.mxu1 }
 0x1da   :  { %v1703_v53 = vmul.f32 %v3303_v15, %v1622_v19  ;;  %vm1816_vm11 = vcmp.ge.f32.partialorder %v1752_v61, 0.0  ;;  %v1880_v13 = vmul.f32 0.01, %v1752_v61  ;;  %v1359_v50 = vadd.f32 %v1358_v18, %v1149_v0 }
 0x1dc   :  { %v1771_v48 = vadd.f32 %v3309_v43, %v1703_v53  ;;  %v1944_v45 = vsel %vm1816_vm11, %v1752_v61, %v1880_v13  ;;  %v1568_v11 = vadd.f32 %v1567_v14, %v1359_v50 }
 0x1dd   :  { %2008 = vst [vmem:[#allocation2 + $0x130] sm:$0xff] %v1944_v45  ;;  %v1425_v45 = vadd.f32 %v3260_v32, %v2923_v29 }
 0x1de   :  { %vm1835_vm12 = vcmp.ge.f32.partialorder %v1771_v48, 0.0  ;;  %v1899_v63 = vmul.f32 0.01, %v1771_v48  ;;  %v1685_v55 = vmul.f32 %v3303_v15, %v1568_v11 }
 0x1df   :  { %v1624_v5 = vpop.f32.mrf.mxu3 }
 0x1e0   :  { %v1963_v34 = vsel %vm1835_vm12, %v1771_v48, %v1899_v63  ;;  %v1576_v23 = vpop.f32.mrf.mxu2  ;;  %v1625_v52 = vadd.f32 %v1624_v5, %v1416_v31  ;;  %v1753_v22 = vadd.f32 %v3309_v43, %v1685_v55  ;;  %v1152_v35 = vpop.f32.mrf.mxu0 }
 0x1e1   :  { %2027 = vst [vmem:[#allocation2 + $0x1c8] sm:$0xff] %v1963_v34  ;;  %v1361_v47 = vpop.f32.mrf.mxu1 }
 0x1e2   :  { %v1704_v28 = vmul.f32 %v3303_v15, %v1625_v52  ;;  %vm1817_vm13 = vcmp.ge.f32.partialorder %v1753_v22, 0.0  ;;  %v1881_v14 = vmul.f32 0.01, %v1753_v22  ;;  %v1362_v10 = vadd.f32 %v1361_v47, %v1152_v35 }
 0x1e4   :  { %v1772_v1 = vadd.f32 %v3309_v43, %v1704_v28  ;;  %v1945_v20 = vsel %vm1817_vm13, %v1753_v22, %v1881_v14  ;;  %v1571_v16 = vadd.f32 %v1570_v54, %v1362_v10  ;;  %v1428_v10 = vadd.f32 %v3275_v38, %v2943_v57 }
 0x1e5   :  { %2009 = vst [vmem:[#allocation2 + $0x138] sm:$0xff] %v1945_v20 }
 0x1e6   :  { %vm1836_vm14 = vcmp.ge.f32.partialorder %v1772_v1, 0.0  ;;  %v1900_v27 = vmul.f32 0.01, %v1772_v1  ;;  %v1686_v36 = vmul.f32 %v3303_v15, %v1571_v16 }
 0x1e7   :  { %v1627_v56 = vpop.f32.mrf.mxu3 }
 0x1e8   :  { %v1964_v2 = vsel %vm1836_vm14, %v1772_v1, %v1900_v27  ;;  %v1579_v40 = vpop.f32.mrf.mxu2  ;;  %v1628_v59 = vadd.f32 %v1627_v56, %v1419_v24  ;;  %v1754_v26 = vadd.f32 %v3309_v43, %v1686_v36  ;;  %v1155_v37 = vpop.f32.mrf.mxu0 }
 0x1e9   :  { %2028 = vst [vmem:[#allocation2 + $0x1d0] sm:$0xff] %v1964_v2  ;;  %v1364_v8 = vpop.f32.mrf.mxu1 }
 0x1ea   :  { %v1705_v21 = vmul.f32 %v3303_v15, %v1628_v59  ;;  %vm1818_vm1 = vcmp.ge.f32.partialorder %v1754_v26, 0.0  ;;  %v1882_v54 = vmul.f32 0.01, %v1754_v26  ;;  %v1365_v9 = vadd.f32 %v1364_v8, %v1155_v37 }
 0x1eb   :  { %v1431_v8 = vadd.f32 %v3281_v4, %v2963_v12 }
 0x1ec   :  { %v1773_v39 = vadd.f32 %v3309_v43, %v1705_v21  ;;  %v1946_v49 = vsel %vm1818_vm1, %v1754_v26, %v1882_v54  ;;  %v1574_v60 = vadd.f32 %v1573_v17, %v1365_v9 }
 0x1ed   :  { %2010 = vst [vmem:[#allocation2 + $0x140] sm:$0xff] %v1946_v49 }
 0x1ee   :  { %vm1837_vm15 = vcmp.ge.f32.partialorder %v1773_v39, 0.0  ;;  %v1901_v6 = vmul.f32 0.01, %v1773_v39  ;;  %v1687_v46 = vmul.f32 %v3303_v15, %v1574_v60 }
 0x1ef   :  { %v1630_v58 = vpop.f32.mrf.mxu3 }
 0x1f0   :  { %v1965_v41 = vsel %vm1837_vm15, %v1773_v39, %v1901_v6  ;;  %v1582_v19 = vpop.f32.mrf.mxu2  ;;  %v1631_v61 = vadd.f32 %v1630_v58, %v1422_v3  ;;  %v1755_v0 = vadd.f32 %v3309_v43, %v1687_v46  ;;  %v1158_v53 = vpop.f32.mrf.mxu0 }
 0x1f1   :  { %2029 = vst [vmem:[#allocation2 + $0x1d8] sm:$0xff] %v1965_v41  ;;  %v1367_v13 = vpop.f32.mrf.mxu1 }
 0x1f2   :  { %v1706_v18 = vmul.f32 %v3303_v15, %v1631_v61  ;;  %vm1819_vm0 = vcmp.ge.f32.partialorder %v1755_v0, 0.0  ;;  %v1883_v17 = vmul.f32 0.01, %v1755_v0  ;;  %v1368_v50 = vadd.f32 %v1367_v13, %v1158_v53 }
 0x1f4   :  { %v1774_v62 = vadd.f32 %v3309_v43, %v1706_v18  ;;  %v1947_v51 = vsel %vm1819_vm0, %v1755_v0, %v1883_v17  ;;  %v1577_v48 = vadd.f32 %v1576_v23, %v1368_v50  ;;  %v1386_v18 = vadd.f32 %v2989_v33, %v2663_v7 }
 0x1f5   :  { %2011 = vst [vmem:[#allocation2 + $0x148] sm:$0xff] %v1947_v51  ;;  %v1389_v7 = vadd.f32 %v3015_v25, %v2683_v42 }
 0x1f6   :  { %vm1838_vm2 = vcmp.ge.f32.partialorder %v1774_v62, 0.0  ;;  %v1902_v11 = vmul.f32 0.01, %v1774_v62  ;;  %v1688_v31 = vmul.f32 %v3303_v15, %v1577_v48 }
 0x1f7   :  { %v1633_v63 = vpop.f32.mrf.mxu3 }
 0x1f8   :  { %v1966_v55 = vsel %vm1838_vm2, %v1774_v62, %v1902_v11  ;;  %v1585_v5 = vpop.f32.mrf.mxu2  ;;  %v1634_v34 = vadd.f32 %v1633_v63, %v1425_v45  ;;  %v1756_v52 = vadd.f32 %v3309_v43, %v1688_v31  ;;  %v1161_v22 = vpop.f32.mrf.mxu0 }
 0x1f9   :  { %2030 = vst [vmem:[#allocation2 + $0x1e0] sm:$0xff] %v1966_v55  ;;  %v1370_v28 = vpop.f32.mrf.mxu1 }
 0x1fa   :  { %v1707_v35 = vmul.f32 %v3303_v15, %v1634_v34  ;;  %vm1820_vm3 = vcmp.ge.f32.partialorder %v1756_v52, 0.0  ;;  %v1884_v23 = vmul.f32 0.01, %v1756_v52  ;;  %v1371_v47 = vadd.f32 %v1370_v28, %v1161_v22 }
 0x1fc   :  { %v1775_v29 = vadd.f32 %v3309_v43, %v1707_v35  ;;  %v1948_v32 = vsel %vm1820_vm3, %v1756_v52, %v1884_v23  ;;  %v1580_v14 = vadd.f32 %v1579_v40, %v1371_v47 }
 0x1fd   :  { %2012 = vst [vmem:[#allocation2 + $0x150] sm:$0xff] %v1948_v32 }
 0x1fe   :  { %vm1839_vm4 = vcmp.ge.f32.partialorder %v1775_v29, 0.0  ;;  %v1903_v1 = vmul.f32 0.01, %v1775_v29  ;;  %v1689_v20 = vmul.f32 %v3303_v15, %v1580_v14 }
 0x1ff   :  { %v1636_v16 = vpop.f32.mrf.mxu3 }
 0x200   :  { %v1967_v24 = vsel %vm1839_vm4, %v1775_v29, %v1903_v1  ;;  %v1588_v27 = vpop.f32.mrf.mxu2  ;;  %v1637_v36 = vadd.f32 %v1636_v16, %v1428_v10  ;;  %v1757_v56 = vadd.f32 %v3309_v43, %v1689_v20  ;;  %v1164_v2 = vpop.f32.mrf.mxu0  ;;  %v1392_v20 = vadd.f32 %v3036_v30, %v2703_v44 }
 0x201   :  { %2031 = vst [vmem:[#allocation2 + $0x1e8] sm:$0xff] %v1967_v24  ;;  %v1373_v26 = vpop.f32.mrf.mxu1 }
 0x202   :  { %v1708_v59 = vmul.f32 %v3303_v15, %v1637_v36  ;;  %vm1821_vm5 = vcmp.ge.f32.partialorder %v1757_v56, 0.0  ;;  %v1885_v40 = vmul.f32 0.01, %v1757_v56  ;;  %v1374_v37 = vadd.f32 %v1373_v26, %v1164_v2 }
 0x204   :  { %v1776_v57 = vadd.f32 %v3309_v43, %v1708_v59  ;;  %v1949_v38 = vsel %vm1821_vm5, %v1757_v56, %v1885_v40  ;;  %v1583_v21 = vadd.f32 %v1582_v19, %v1374_v37 }
 0x205   :  { %2013 = vst [vmem:[#allocation2 + $0x158] sm:$0xff] %v1949_v38 }
 0x206   :  { %vm1840_vm6 = vcmp.ge.f32.partialorder %v1776_v57, 0.0  ;;  %v1904_v54 = vmul.f32 0.01, %v1776_v57  ;;  %v1690_v9 = vmul.f32 %v3303_v15, %v1583_v21 }
 0x207   :  { %v1639_v39 = vpop.f32.mrf.mxu3 }
 0x208   :  { %v1968_v49 = vsel %vm1840_vm6, %v1776_v57, %v1904_v54  ;;  %v1591_v60 = vpop.f32.mrf.mxu2  ;;  %v1640_v3 = vadd.f32 %v1639_v39, %v1431_v8  ;;  %v1758_v6 = vadd.f32 %v3309_v43, %v1690_v9  ;;  %v1167_v46 = vpop.f32.mrf.mxu0 }
 0x209   :  { %2032 = vst [vmem:[#allocation2 + $0x1f0] sm:$0xff] %v1968_v49  ;;  %v1376_v41 = vpop.f32.mrf.mxu1 }
 0x20a   :  { %v1709_v58 = vmul.f32 %v3303_v15, %v1640_v3  ;;  %vm1822_vm7 = vcmp.ge.f32.partialorder %v1758_v6, 0.0  ;;  %v1886_v19 = vmul.f32 0.01, %v1758_v6  ;;  %v1377_v61 = vadd.f32 %v1376_v41, %v1167_v46 }
 0x20c   :  { %v1777_v12 = vadd.f32 %v3309_v43, %v1709_v58  ;;  %v1950_v4 = vsel %vm1822_vm7, %v1758_v6, %v1886_v19  ;;  %v1586_v0 = vadd.f32 %v1585_v5, %v1377_v61 }
 0x20d   :  { %2014 = vst [vmem:[#allocation2 + $0x160] sm:$0xff] %v1950_v4 }
 0x20e   :  { %vm1841_vm8 = vcmp.ge.f32.partialorder %v1777_v12, 0.0  ;;  %v1905_v53 = vmul.f32 0.01, %v1777_v12  ;;  %v1691_v13 = vmul.f32 %v3303_v15, %v1586_v0 }
 0x210   :  { %v1969_v17 = vsel %vm1841_vm8, %v1777_v12, %v1905_v53  ;;  %v1594_v50 = vpop.f32.mrf.mxu2  ;;  %v1759_v62 = vadd.f32 %v3309_v43, %v1691_v13  ;;  %v1170_v48 = vpop.f32.mrf.mxu0 }
 0x211   :  { %2033 = vst [vmem:[#allocation2 + $0x1f8] sm:$0xff] %v1969_v17  ;;  %v1595_v51 = vadd.f32 %v1594_v50, %v1386_v18  ;;  %v1379_v45 = vpop.f32.mrf.mxu1 }
 0x212   :  { %vm1823_vm9 = vcmp.ge.f32.partialorder %v1759_v62, 0.0  ;;  %v1887_v11 = vmul.f32 0.01, %v1759_v62  ;;  %v1380_v63 = vadd.f32 %v1379_v45, %v1170_v48 }
 0x213   :  { %v1694_v31 = vmul.f32 %v3303_v15, %v1595_v51 }
 0x214   :  { %v1951_v55 = vsel %vm1823_vm9, %v1759_v62, %v1887_v11  ;;  %v1589_v34 = vadd.f32 %v1588_v27, %v1380_v63 }
 0x215   :  { %v1762_v5 = vadd.f32 %v3309_v43, %v1694_v31  ;;  %2015 = vst [vmem:[#allocation2 + $0x168] sm:$0xff] %v1951_v55 }
 0x216   :  { %v1692_v52 = vmul.f32 %v3303_v15, %v1589_v34 }
 0x217   :  { %vm1826_vm10 = vcmp.ge.f32.partialorder %v1762_v5, 0.0  ;;  %v1890_v33 = vmul.f32 0.01, %v1762_v5 }
 0x218   :  { %v1597_v22 = vpop.f32.mrf.mxu2  ;;  %v1760_v28 = vadd.f32 %v3309_v43, %v1692_v52  ;;  %v1173_v47 = vpop.f32.mrf.mxu0 }
 0x219   :  { %v1954_v35 = vsel %vm1826_vm10, %v1762_v5, %v1890_v33  ;;  %v1598_v23 = vadd.f32 %v1597_v22, %v1389_v7  ;;  %v1382_v29 = vpop.f32.mrf.mxu1 }
 0x21a   :  { %2018 = vst [vmem:[#allocation2 + $0x180] sm:$0xff] %v1954_v35  ;;  %vm1824_vm11 = vcmp.ge.f32.partialorder %v1760_v28, 0.0  ;;  %v1888_v32 = vmul.f32 0.01, %v1760_v28  ;;  %v1383_v10 = vadd.f32 %v1382_v29, %v1173_v47 }
 0x21b   :  { %v1695_v14 = vmul.f32 %v3303_v15, %v1598_v23 }
 0x21c   :  { %v1952_v1 = vsel %vm1824_vm11, %v1760_v28, %v1888_v32  ;;  %v1592_v25 = vadd.f32 %v1591_v60, %v1383_v10 }
 0x21d   :  { %v1763_v42 = vadd.f32 %v3309_v43, %v1695_v14  ;;  %2016 = vst [vmem:[#allocation2 + $0x170] sm:$0xff] %v1952_v1 }
 0x21e   :  { %v1693_v24 = vmul.f32 %v3303_v15, %v1592_v25 }
 0x21f   :  { %vm1827_vm12 = vcmp.ge.f32.partialorder %v1763_v42, 0.0  ;;  %v1891_v16 = vmul.f32 0.01, %v1763_v42 }
 0x220   :  { %v1600_v27 = vpop.f32.mrf.mxu2  ;;  %v1761_v56 = vadd.f32 %v3309_v43, %v1693_v24 }
 0x221   :  { %v1955_v36 = vsel %vm1827_vm12, %v1763_v42, %v1891_v16  ;;  %v1601_v2 = vadd.f32 %v1600_v27, %v1392_v20 }
 0x222   :  { %2019 = vst [vmem:[#allocation2 + $0x188] sm:$0xff] %v1955_v36  ;;  %vm1825_vm13 = vcmp.ge.f32.partialorder %v1761_v56, 0.0  ;;  %v1889_v59 = vmul.f32 0.01, %v1761_v56 }
 0x223   :  { %v1696_v26 = vmul.f32 %v3303_v15, %v1601_v2 }
 0x224   :  { %v1953_v44 = vsel %vm1825_vm13, %v1761_v56, %v1889_v59 }
 0x225   :  { %v1764_v30 = vadd.f32 %v3309_v43, %v1696_v26  ;;  %2017 = vst [vmem:[#allocation2 + $0x178] sm:$0xff] %v1953_v44 }
 0x227   :  { %vm1828_vm14 = vcmp.ge.f32.partialorder %v1764_v30, 0.0  ;;  %v1892_v40 = vmul.f32 0.01, %v1764_v30 }
 0x229   :  { %v1956_v37 = vsel %vm1828_vm14, %v1764_v30, %v1892_v40 }
 0x22a   :  { %2020 = vst [vmem:[#allocation2 + $0x190] sm:$0xff] %v1956_v37 }
 0x22b   :  { %2046 = dma.vmem_to_hbm [thread:$0]  %s2039_s3, 8192, %s2041_s27, [#allocation3], %s2188_s28, %s2188_s28, %s2189_s29  }
 0x22c   :  { %2185 = dma.done.wait [#allocation3], 8192  }
 0x22d   :  { %2186 = vsyncadd [#allocation3], 4294959104 }
 0x22e   :  { %2051 = vsyncpa [#allocation3], 1 }

</bundles_post_ra>
